<compile_context>
chip_gen: v7x
topology: tpu7x:2x2x1
jax: 0.10.0
libtpu: 0.0.40
codegen_flags: <defaults>
</compile_context>

<pallas_src>
import functools

import jax
import jax.numpy as jnp
from jax import lax
from jax.experimental import pallas as pl
from jax.experimental.pallas import tpu as pltpu


# ----------------------------- small helpers --------------------------------

def _round_up(x, m):
    return (x + m - 1) // m * m


def _device_kind():
    try:
        return jax.devices()[0].device_kind.lower()
    except Exception:
        return ""


def _default_compute_dtype():
    # bf16 VALU/EUP exists on v6e / v7x; v5e (and older) has no bf16 VPU -> f32.
    kind = _device_kind()
    if any(t in kind for t in ("v2", "v3", "v4", "v5")):
        return jnp.float32
    return jnp.bfloat16


def _default_vmem_limit():
    kind = _device_kind()
    if "v7" in kind or "7x" in kind:
        return 48 * 1024 * 1024      # v7x: 64 MiB physical VMEM -> leave headroom
    return 64 * 1024 * 1024          # v5e / v6e: 128 MiB physical VMEM


def _pick_batch_tile(N, batch_tile, bytes_per_image_io, fixed_bytes, vmem_limit):
    """Largest divisor of N that (a) leaves >= 2 grid steps when N >= 2 (two
    TensorCores on v7x shard the parallel batch axis) and (b) keeps the
    double-buffered IO blocks + resident weights/taps inside the VMEM budget."""
    cap = max(1, min(batch_tile, max(1, N // 2)))
    budget = int(vmem_limit * 0.75)
    while cap > 1 and fixed_bytes + 2 * cap * bytes_per_image_io > budget:
        cap -= 1
    best = 1
    for d in range(1, N + 1):
        if N % d == 0 and d <= cap:
            best = d
    return best


def _div_mod(idx, n):
    """Vector floor-div / mod by a static positive int (shift/and when n == 2^k)."""
    if n & (n - 1) == 0:
        sh = n.bit_length() - 1
        return jnp.right_shift(idx, sh), jnp.bitwise_and(idx, n - 1)
    return idx // n, idx % n


# ------------------------------- the kernel ---------------------------------

def _make_kernel(H, W, H_out, W_out, HW_pad, HW_out_pad, C_in, C_out, hidden,
                 k, pad, stride, use_res, has_expand, B_tile, cdt):
    HW = H * W
    HW_out = H_out * W_out
    same_size = (stride == 1 and H_out == H and W_out == W)
    inv_hw = 1.0 / float(HW_out)               # exact compile-time constant
    need_lane_fix = HW_out_pad != HW_out       # padded lanes must not feed SE mean

    # Static tap table: (flat tap index, row offset, col offset).
    taps = [(ki * k + kj, ki - pad, kj - pad) for ki in range(k) for kj in range(k)]

    def kernel(*refs):
        it = iter(refs)
        x_ref = next(it)
        if has_expand:
            w_exp_ref, bn1_s_ref, bn1_b_ref = next(it), next(it), next(it)
        w_dw_ref, bn2_s_ref, bn2_b_ref = next(it), next(it), next(it)
        w_ser_ref, b_ser_ref = next(it), next(it)
        w_see_ref, b_see_ref = next(it), next(it)
        w_pl_ref, bn3_s_ref, bn3_b_ref = next(it), next(it), next(it)
        out_ref = next(it)

        # ---- hoisted per-grid-step constants (loaded / built once per tile) ----
        if has_expand:
            w_exp = w_exp_ref[...]                              # (hidden, C_in)  cdt
            bn1_s, bn1_b = bn1_s_ref[...], bn1_b_ref[...]       # (hidden, 1)     cdt
        bn2_s, bn2_b = bn2_s_ref[...], bn2_b_ref[...]           # (hidden, 1)     cdt
        w_ser, b_ser = w_ser_ref[...], b_ser_ref[...]           # (hidden,rd),(1,rd) f32
        w_see_t, b_see = w_see_ref[...], b_see_ref[...]         # (hidden,rd),(hidden,1) f32
        w_pl_t = w_pl_ref[...]                                  # (C_out, hidden) cdt
        bn3_s, bn3_b = bn3_s_ref[...], bn3_b_ref[...]           # (C_out, 1)      f32
        w_dw = w_dw_ref[...]                                    # (hidden, k*k)   cdt

        # Boundary masks fused into the per-tap depthwise weights -> the tap inner
        # loop is one mul + one add (no select). Built once per grid step.
        q = lax.broadcasted_iota(jnp.int32, (1, HW_pad), 1)     # flat spatial index
        if (W & (W - 1)) == 0:
            j_idx = jnp.bitwise_and(q, W - 1)                   # column j = q % W
        else:
            j_idx = q % W
        w_taps = []
        for t, di, dj in taps:
            col = w_dw[:, t:t + 1]                              # (hidden, 1)
            conds = []
            if di < 0:
                conds.append(q >= (-di) * W)                    # source row i + di >= 0
            if di > 0:
                conds.append(q < (H - di) * W)                  # source row i + di <  H
            if dj < 0:
                conds.append(j_idx >= -dj)                      # source col j + dj >= 0
            if dj > 0:
                conds.append(j_idx < W - dj)                    # source col j + dj <  W
            if conds:
                m = conds[0]
                for c in conds[1:]:
                    m = jnp.logical_and(m, c)
                w_taps.append(jnp.where(m, col, jnp.zeros_like(col)))   # (hidden, HW_pad)
            else:
                w_taps.append(col)                              # interior tap: thin column

        if not same_size:
            # One-hot subsample matrix: output lane r selects stride-1 accumulator
            # lane (r // W_out) * stride * W + (r % W_out) * stride; padded output
            # lanes (r >= HW_out) select nothing -> come out exactly zero.
            rr = lax.broadcasted_iota(jnp.int32, (HW_pad, HW_out_pad), 1)
            pp = lax.broadcasted_iota(jnp.int32, (HW_pad, HW_out_pad), 0)
            r_row, r_col = _div_mod(rr, W_out)
            src = r_row * (stride * W) + r_col * stride
            src = jnp.where(rr < HW_out, src, -1)
            subsel = (pp == src).astype(cdt)                    # (HW_pad, HW_out_pad)
        if need_lane_fix:
            lane_valid = lax.broadcasted_iota(jnp.int32, (1, HW_out_pad), 1) < HW_out

        def body(b, carry):
            x = x_ref[b]                                        # (C_in, HW_pad) f32

            # -- inverted bottleneck: 1x1 conv -> folded BN -> ReLU6 --
            if has_expand:
                h = jnp.dot(w_exp, x.astype(cdt),
                            preferred_element_type=jnp.float32)  # f32 accumulate
                h = jnp.clip(h.astype(cdt) * bn1_s + bn1_b, 0.0, 6.0)
            else:
                h = x.astype(cdt)                               # hidden == C_in

            # -- depthwise k x k conv: lane rolls x mask-fused tap weights --
            acc = None
            for (t, di, dj), wt in zip(taps, w_taps):
                delta = di * W + dj
                shifted = h if delta == 0 else pltpu.roll(h, (-delta) % HW_pad, axis=1)
                contrib = shifted * wt
                acc = contrib if acc is None else acc + contrib

            if not same_size:
                # TODO(synk): this still MACs the full stride-1 grid before the MXU
                # selects the output lanes; a per-tap pre-subsample (stride^2 less
                # VPU work) needs strided lane gathers and is left as follow-up.
                acc = jnp.dot(acc, subsel,
                              preferred_element_type=jnp.float32).astype(cdt)

            g = jnp.clip(acc * bn2_s + bn2_b, 0.0, 6.0)          # (hidden, HW_out_pad)
            if need_lane_fix:
                g = jnp.where(lane_valid, g, jnp.zeros_like(g))  # keep SE mean exact

            # -- squeeze-excite: bcast-mul + cross-lane/sublane reduces, f32 --
            mean_c = jnp.sum(g.astype(jnp.float32), axis=1, keepdims=True) * inv_hw
            se = jnp.sum(mean_c * w_ser, axis=0, keepdims=True) + b_ser      # (1, rd)
            se = jnp.clip(se, 0.0, 6.0)
            gate = jnp.sum(se * w_see_t, axis=1, keepdims=True) + b_see      # (hidden, 1)
            g = g * jax.nn.sigmoid(gate).astype(cdt)

            # -- point-linear 1x1 conv -> folded BN (+ residual), f32 accumulate --
            # TODO(synk): batch this dot across the tile (N = B_tile * HW_out) once
            # the MXU becomes the binding unit.
            y = jnp.dot(w_pl_t, g, preferred_element_type=jnp.float32)
            y = y * bn3_s + bn3_b
            if use_res:
                y = y + x
            out_ref[b] = y                                       # lane-dense store
            return carry

        lax.fori_loop(0, B_tile, body, 0)

    return kernel


# ------------------------------- the wrapper --------------------------------

def inverted_residual_se(x_nchw, params, *, kernel_size, padding, stride,
                         expand_ratio, batch_tile=8, compute_dtype=None):
    N, C_in, H, W = x_nchw.shape
    hidden = round(C_in * expand_ratio)
    C_out = params["w_pl"].shape[1]
    k, pad = kernel_size, padding
    H_out = (H + 2 * pad - k) // stride + 1
    W_out = (W + 2 * pad - k) // stride + 1
    use_res = (stride == 1) and (C_in == C_out)
    has_expand = expand_ratio != 1
    same_size = (stride == 1 and H_out == H and W_out == W)
    if not same_size:
        assert (H_out - 1) * stride <= H - 1 and (W_out - 1) * stride <= W - 1, \
            "unsupported kernel/padding/stride combination"

    HW, HW_out = H * W, H_out * W_out
    HW_pad, HW_out_pad = _round_up(HW, 128), _round_up(HW_out, 128)

    cdt = compute_dtype if compute_dtype is not None else _default_compute_dtype()
    esz = jnp.dtype(cdt).itemsize
    vmem_limit = _default_vmem_limit()

    # Rough VMEM bookkeeping for the batch-tile choice: f32 IO blocks are
    # double-buffered; fused tap weights + per-image intermediates are resident.
    bytes_io = (C_in * HW_pad + C_out * HW_out_pad) * 4
    fixed = (k * k * hidden * HW_pad + 4 * hidden * HW_pad
             + hidden * HW_out_pad) * esz + (2 << 20)
    B_tile = _pick_batch_tile(N, batch_tile, bytes_io, fixed, vmem_limit)

    kernel = _make_kernel(H, W, H_out, W_out, HW_pad, HW_out_pad, C_in, C_out,
                          hidden, k, pad, stride, use_res, has_expand, B_tile, cdt)

    # Kernel layout: channels on sublanes, padded H*W on lanes (free reshape).
    x = x_nchw.reshape(N, C_in, HW).astype(jnp.float32)
    if HW_pad != HW:
        x = jnp.pad(x, ((0, 0), (0, 0), (0, HW_pad - HW)))

    f32 = jnp.float32
    weights = []
    if has_expand:
        weights += [
            jnp.transpose(params["w_exp"]).astype(cdt),                       # (hidden, C_in)
            params["bn1_s"].reshape(hidden, 1).astype(cdt),
            params["bn1_b"].reshape(hidden, 1).astype(cdt),
        ]
    weights += [
        jnp.transpose(params["w_dw"].reshape(k * k, hidden)).astype(cdt),     # (hidden, k*k)
        params["bn2_s"].reshape(hidden, 1).astype(cdt),
        params["bn2_b"].reshape(hidden, 1).astype(cdt),
        params["w_ser"].astype(f32),                                          # (hidden, rd)
        params["b_ser"].reshape(1, -1).astype(f32),                           # (1, rd)
        jnp.transpose(params["w_see"]).astype(f32),                           # (hidden, rd)
        params["b_see"].reshape(hidden, 1).astype(f32),                       # (hidden, 1)
        jnp.transpose(params["w_pl"]).astype(cdt),                            # (C_out, hidden)
        params["bn3_s"].reshape(C_out, 1).astype(f32),
        params["bn3_b"].reshape(C_out, 1).astype(f32),
    ]

    def const_spec(a):
        nd = a.ndim
        # Constant-index weight blocks: single buffer (no double-buffer VMEM).
        return pl.BlockSpec(a.shape, lambda n, _nd=nd: (0,) * _nd,
                            pipeline_mode=pl.Buffered(1))

    out = pl.pallas_call(
        kernel,
        out_shape=jax.ShapeDtypeStruct((N, C_out, HW_out_pad), jnp.float32),
        grid=(N // B_tile,),
        in_specs=[pl.BlockSpec((B_tile, C_in, HW_pad), lambda n: (n, 0, 0))]
                 + [const_spec(w) for w in weights],
        out_specs=pl.BlockSpec((B_tile, C_out, HW_out_pad), lambda n: (n, 0, 0)),
        compiler_params=pltpu.CompilerParams(
            dimension_semantics=("parallel",),
            vmem_limit_bytes=vmem_limit,
        ),
    )(x, *weights)

    # Strip lane padding and return NCHW (free reshape).
    return out[:, :, :HW_out].reshape(N, C_out, H_out, W_out)


# ------------------------- parameters & pure-JAX reference ------------------

def init_params(key, C_in, C_out, kernel_size, expand_ratio, affine=True):
    hidden = round(C_in * expand_ratio)
    rd = round(hidden * (1.0 / expand_ratio))     # SqueezeExcite rd_channels
    ks = jax.random.split(key, 16)
    eps = 1e-5

    def bn(kg, kb, c):
        if affine:
            gamma = jax.random.uniform(kg, (c,), jnp.float32, 0.5, 1.5)
            beta = jax.random.normal(kb, (c,), jnp.float32) * 0.1
        else:
            gamma = jnp.ones((c,), jnp.float32)
            beta = jnp.zeros((c,), jnp.float32)
        run_mean = jnp.zeros((c,), jnp.float32)
        run_var = jnp.ones((c,), jnp.float32)
        scale = gamma / jnp.sqrt(run_var + eps)
        bias = beta - run_mean * scale
        return scale.reshape(1, c), bias.reshape(1, c)

    p = dict(
        w_exp=jax.random.normal(ks[0], (C_in, hidden), jnp.float32) * 0.2,
        w_dw=jax.random.normal(ks[1], (kernel_size, kernel_size, hidden), jnp.float32) * 0.2,
        w_ser=jax.random.normal(ks[2], (hidden, rd), jnp.float32) * 0.2,
        b_ser=jax.random.normal(ks[3], (1, rd), jnp.float32) * 0.1,
        w_see=jax.random.normal(ks[4], (rd, hidden), jnp.float32) * 0.2,
        b_see=jax.random.normal(ks[5], (1, hidden), jnp.float32) * 0.1,
        w_pl=jax.random.normal(ks[6], (hidden, C_out), jnp.float32) * 0.2,
    )
    p["bn1_s"], p["bn1_b"] = bn(ks[7], ks[8], hidden)
    p["bn2_s"], p["bn2_b"] = bn(ks[9], ks[10], hidden)
    p["bn3_s"], p["bn3_b"] = bn(ks[11], ks[12], C_out)
    return p


def reference(x_nchw, p, *, kernel_size, padding, stride, expand_ratio):
    # Pure-JAX reference (same math, different conv mechanism) for verification.
    N, C_in, H, W = x_nchw.shape
    hidden = round(C_in * expand_ratio)
    C_out = p["w_pl"].shape[1]
    use_res = (stride == 1) and (C_in == C_out)
    x = jnp.transpose(x_nchw, (0, 2, 3, 1)).astype(jnp.float32)

    if expand_ratio != 1:
        h = jnp.einsum("nhwc,cd->nhwd", x, p["w_exp"])
        h = jnp.clip(h * p["bn1_s"][0] + p["bn1_b"][0], 0.0, 6.0)
    else:
        h = x

    dw = p["w_dw"].reshape(kernel_size, kernel_size, 1, hidden)   # HWIO, I/group = 1
    h = lax.conv_general_dilated(
        h, dw, (stride, stride), [(padding, padding), (padding, padding)],
        dimension_numbers=("NHWC", "HWIO", "NHWC"), feature_group_count=hidden)
    h = jnp.clip(h * p["bn2_s"][0] + p["bn2_b"][0], 0.0, 6.0)

    se = h.mean((1, 2), keepdims=True)
    se = jnp.clip(jnp.einsum("nhwc,cd->nhwd", se, p["w_ser"]) + p["b_ser"][0], 0.0, 6.0)
    se = jnp.einsum("nhwc,cd->nhwd", se, p["w_see"]) + p["b_see"][0]
    h = h * jax.nn.sigmoid(se)

    y = jnp.einsum("nhwc,cd->nhwd", h, p["w_pl"])
    y = y * p["bn3_s"][0] + p["bn3_b"][0]
    if use_res:
        y = y + x
    return jnp.transpose(y, (0, 3, 1, 2))


# ----------------------------------- test -----------------------------------

if __name__ == "__main__":
    key = jax.random.PRNGKey(0)
    # (N, C_in, C_out, H, W, k, pad, stride, expand_ratio)
    configs = [
        (2, 4, 4, 16, 16, 3, 1, 1, 4),   # expand + SE + residual (main path)
        (2, 4, 8, 16, 16, 3, 1, 2, 4),   # stride-2, no residual, padded output lanes
        (2, 4, 4, 16, 16, 3, 1, 1, 1),   # expand_ratio == 1 (no inverted bottleneck)
    ]
    auto_dt = _default_compute_dtype()

    for idx, (N, C_in, C_out, H, W, k, pd, s, er) in enumerate(configs):
        key, kx, kp = jax.random.split(key, 3)
        x = jax.random.normal(kx, (N, C_in, H, W), jnp.float32)
        params = init_params(kp, C_in, C_out, k, er, affine=True)
        ref = reference(x, params, kernel_size=k, padding=pd, stride=s, expand_ratio=er)

        dtypes = [jnp.float32]
        if idx == 0 and auto_dt != jnp.float32:
            dtypes.append(auto_dt)   # exercise the bf16 elementwise path on v6e/v7x
        for dt in dtypes:
            run = functools.partial(inverted_residual_se, kernel_size=k, padding=pd,
                                    stride=s, expand_ratio=er, compute_dtype=dt)
            out = jax.block_until_ready(jax.jit(run)(x, params))
            tol = 1e-4 if dt == jnp.float32 else 5e-2
            assert out.shape == ref.shape, f"shape mismatch (config {idx})"
            assert jnp.allclose(out, ref, atol=tol, rtol=tol), \
                f"mismatch vs JAX reference (config {idx}, dtype {jnp.dtype(dt).name})"

    print("KERNEL_OK")
</pallas_src>

<mosaic_0001>
module attributes {stable_mosaic.version = 11 : i64} {
  func.func @kernel(%arg0: i32, %arg1: memref<1x4x256xf32, #tpu.memory_space<vmem>>, %arg2: memref<16x4xf32, #tpu.memory_space<vmem>>, %arg3: memref<16x1xf32, #tpu.memory_space<vmem>>, %arg4: memref<16x1xf32, #tpu.memory_space<vmem>>, %arg5: memref<16x9xf32, #tpu.memory_space<vmem>>, %arg6: memref<16x1xf32, #tpu.memory_space<vmem>>, %arg7: memref<16x1xf32, #tpu.memory_space<vmem>>, %arg8: memref<16x4xf32, #tpu.memory_space<vmem>>, %arg9: memref<1x4xf32, #tpu.memory_space<vmem>>, %arg10: memref<16x4xf32, #tpu.memory_space<vmem>>, %arg11: memref<16x1xf32, #tpu.memory_space<vmem>>, %arg12: memref<4x16xf32, #tpu.memory_space<vmem>>, %arg13: memref<4x1xf32, #tpu.memory_space<vmem>>, %arg14: memref<4x1xf32, #tpu.memory_space<vmem>>, %arg15: memref<1x4x256xf32, #tpu.memory_space<vmem>>) attributes {dimension_semantics = [#tpu.dimension_semantics<parallel>], iteration_bounds = array<i64: 2>, scalar_prefetch = 0 : i64, scratch_operands = 0 : i64, tpu.core_type = #tpu.core_type<tc>, window_params = [{transform_indices = @transform_0, window_bounds = array<i64: 1, 4, 256>}, {pipeline_mode = #tpu.pipeline_mode<synchronous>, transform_indices = @transform_1, window_bounds = array<i64: 16, 4>}, {pipeline_mode = #tpu.pipeline_mode<synchronous>, transform_indices = @transform_2, window_bounds = array<i64: 16, 1>}, {pipeline_mode = #tpu.pipeline_mode<synchronous>, transform_indices = @transform_3, window_bounds = array<i64: 16, 1>}, {pipeline_mode = #tpu.pipeline_mode<synchronous>, transform_indices = @transform_4, window_bounds = array<i64: 16, 9>}, {pipeline_mode = #tpu.pipeline_mode<synchronous>, transform_indices = @transform_5, window_bounds = array<i64: 16, 1>}, {pipeline_mode = #tpu.pipeline_mode<synchronous>, transform_indices = @transform_6, window_bounds = array<i64: 16, 1>}, {pipeline_mode = #tpu.pipeline_mode<synchronous>, transform_indices = @transform_7, window_bounds = array<i64: 16, 4>}, {pipeline_mode = #tpu.pipeline_mode<synchronous>, transform_indices = @transform_8, window_bounds = array<i64: 1, 4>}, {pipeline_mode = #tpu.pipeline_mode<synchronous>, transform_indices = @transform_9, window_bounds = array<i64: 16, 4>}, {pipeline_mode = #tpu.pipeline_mode<synchronous>, transform_indices = @transform_10, window_bounds = array<i64: 16, 1>}, {pipeline_mode = #tpu.pipeline_mode<synchronous>, transform_indices = @transform_11, window_bounds = array<i64: 4, 16>}, {pipeline_mode = #tpu.pipeline_mode<synchronous>, transform_indices = @transform_12, window_bounds = array<i64: 4, 1>}, {pipeline_mode = #tpu.pipeline_mode<synchronous>, transform_indices = @transform_13, window_bounds = array<i64: 4, 1>}, {transform_indices = @transform_14, window_bounds = array<i64: 1, 4, 256>}]} {
    %c0 = arith.constant 0 : index
    %c0_0 = arith.constant 0 : index
    %0 = vector.load %arg2[%c0, %c0_0] : memref<16x4xf32, #tpu.memory_space<vmem>>, vector<16x4xf32>
    %c0_1 = arith.constant 0 : index
    %c0_2 = arith.constant 0 : index
    %1 = vector.load %arg3[%c0_1, %c0_2] : memref<16x1xf32, #tpu.memory_space<vmem>>, vector<16x1xf32>
    %c0_3 = arith.constant 0 : index
    %c0_4 = arith.constant 0 : index
    %2 = vector.load %arg4[%c0_3, %c0_4] : memref<16x1xf32, #tpu.memory_space<vmem>>, vector<16x1xf32>
    %c0_5 = arith.constant 0 : index
    %c0_6 = arith.constant 0 : index
    %3 = vector.load %arg6[%c0_5, %c0_6] : memref<16x1xf32, #tpu.memory_space<vmem>>, vector<16x1xf32>
    %c0_7 = arith.constant 0 : index
    %c0_8 = arith.constant 0 : index
    %4 = vector.load %arg7[%c0_7, %c0_8] : memref<16x1xf32, #tpu.memory_space<vmem>>, vector<16x1xf32>
    %c0_9 = arith.constant 0 : index
    %c0_10 = arith.constant 0 : index
    %5 = vector.load %arg8[%c0_9, %c0_10] : memref<16x4xf32, #tpu.memory_space<vmem>>, vector<16x4xf32>
    %c0_11 = arith.constant 0 : index
    %c0_12 = arith.constant 0 : index
    %6 = vector.load %arg9[%c0_11, %c0_12] : memref<1x4xf32, #tpu.memory_space<vmem>>, vector<1x4xf32>
    %c0_13 = arith.constant 0 : index
    %c0_14 = arith.constant 0 : index
    %7 = vector.load %arg10[%c0_13, %c0_14] : memref<16x4xf32, #tpu.memory_space<vmem>>, vector<16x4xf32>
    %c0_15 = arith.constant 0 : index
    %c0_16 = arith.constant 0 : index
    %8 = vector.load %arg11[%c0_15, %c0_16] : memref<16x1xf32, #tpu.memory_space<vmem>>, vector<16x1xf32>
    %c0_17 = arith.constant 0 : index
    %c0_18 = arith.constant 0 : index
    %9 = vector.load %arg12[%c0_17, %c0_18] : memref<4x16xf32, #tpu.memory_space<vmem>>, vector<4x16xf32>
    %c0_19 = arith.constant 0 : index
    %c0_20 = arith.constant 0 : index
    %10 = vector.load %arg13[%c0_19, %c0_20] : memref<4x1xf32, #tpu.memory_space<vmem>>, vector<4x1xf32>
    %c0_21 = arith.constant 0 : index
    %c0_22 = arith.constant 0 : index
    %11 = vector.load %arg14[%c0_21, %c0_22] : memref<4x1xf32, #tpu.memory_space<vmem>>, vector<4x1xf32>
    %c0_23 = arith.constant 0 : index
    %c0_24 = arith.constant 0 : index
    %12 = vector.load %arg5[%c0_23, %c0_24] : memref<16x9xf32, #tpu.memory_space<vmem>>, vector<16x9xf32>
    %13 = tpu.iota {dimensions = array<i32: 1>} : vector<1x256xi32>
    %c15_i32 = arith.constant 15 : i32
    %14 = vector.broadcast %c15_i32 : i32 to vector<1x256xi32>
    %15 = arith.andi %13, %14 : vector<1x256xi32>
    %16 = vector.extract_strided_slice %12 {offsets = [0, 0], sizes = [16, 1], strides = [1, 1]} : vector<16x9xf32> to vector<16x1xf32>
    %c16_i32 = arith.constant 16 : i32
    %17 = vector.broadcast %c16_i32 : i32 to vector<1x256xi32>
    %18 = arith.cmpi sge, %13, %17 : vector<1x256xi32>
    %c1_i32 = arith.constant 1 : i32
    %19 = vector.broadcast %c1_i32 : i32 to vector<1x256xi32>
    %20 = arith.cmpi sge, %15, %19 : vector<1x256xi32>
    %21 = arith.andi %18, %20 : vector<1x256xi1>
    %cst = arith.constant 0.000000e+00 : f32
    %22 = vector.broadcast %cst : f32 to vector<16x1xf32>
    %23 = vector.shape_cast %21 : vector<1x256xi1> to vector<1x256xi1>
    %24 = vector.broadcast %23 : vector<1x256xi1> to vector<16x256xi1>
    %25 = vector.shape_cast %16 : vector<16x1xf32> to vector<16x1xf32>
    %26 = vector.broadcast %25 : vector<16x1xf32> to vector<16x256xf32>
    %27 = vector.shape_cast %22 : vector<16x1xf32> to vector<16x1xf32>
    %28 = vector.broadcast %27 : vector<16x1xf32> to vector<16x256xf32>
    %29 = arith.select %24, %26, %28 : vector<16x256xi1>, vector<16x256xf32>
    %30 = vector.extract_strided_slice %12 {offsets = [0, 1], sizes = [16, 1], strides = [1, 1]} : vector<16x9xf32> to vector<16x1xf32>
    %c16_i32_25 = arith.constant 16 : i32
    %31 = vector.broadcast %c16_i32_25 : i32 to vector<1x256xi32>
    %32 = arith.cmpi sge, %13, %31 : vector<1x256xi32>
    %cst_26 = arith.constant 0.000000e+00 : f32
    %33 = vector.broadcast %cst_26 : f32 to vector<16x1xf32>
    %34 = vector.shape_cast %32 : vector<1x256xi1> to vector<1x256xi1>
    %35 = vector.broadcast %34 : vector<1x256xi1> to vector<16x256xi1>
    %36 = vector.shape_cast %30 : vector<16x1xf32> to vector<16x1xf32>
    %37 = vector.broadcast %36 : vector<16x1xf32> to vector<16x256xf32>
    %38 = vector.shape_cast %33 : vector<16x1xf32> to vector<16x1xf32>
    %39 = vector.broadcast %38 : vector<16x1xf32> to vector<16x256xf32>
    %40 = arith.select %35, %37, %39 : vector<16x256xi1>, vector<16x256xf32>
    %41 = vector.extract_strided_slice %12 {offsets = [0, 2], sizes = [16, 1], strides = [1, 1]} : vector<16x9xf32> to vector<16x1xf32>
    %c16_i32_27 = arith.constant 16 : i32
    %42 = vector.broadcast %c16_i32_27 : i32 to vector<1x256xi32>
    %43 = arith.cmpi sge, %13, %42 : vector<1x256xi32>
    %c15_i32_28 = arith.constant 15 : i32
    %44 = vector.broadcast %c15_i32_28 : i32 to vector<1x256xi32>
    %45 = arith.cmpi slt, %15, %44 : vector<1x256xi32>
    %46 = arith.andi %43, %45 : vector<1x256xi1>
    %cst_29 = arith.constant 0.000000e+00 : f32
    %47 = vector.broadcast %cst_29 : f32 to vector<16x1xf32>
    %48 = vector.shape_cast %46 : vector<1x256xi1> to vector<1x256xi1>
    %49 = vector.broadcast %48 : vector<1x256xi1> to vector<16x256xi1>
    %50 = vector.shape_cast %41 : vector<16x1xf32> to vector<16x1xf32>
    %51 = vector.broadcast %50 : vector<16x1xf32> to vector<16x256xf32>
    %52 = vector.shape_cast %47 : vector<16x1xf32> to vector<16x1xf32>
    %53 = vector.broadcast %52 : vector<16x1xf32> to vector<16x256xf32>
    %54 = arith.select %49, %51, %53 : vector<16x256xi1>, vector<16x256xf32>
    %55 = vector.extract_strided_slice %12 {offsets = [0, 3], sizes = [16, 1], strides = [1, 1]} : vector<16x9xf32> to vector<16x1xf32>
    %c1_i32_30 = arith.constant 1 : i32
    %56 = vector.broadcast %c1_i32_30 : i32 to vector<1x256xi32>
    %57 = arith.cmpi sge, %15, %56 : vector<1x256xi32>
    %cst_31 = arith.constant 0.000000e+00 : f32
    %58 = vector.broadcast %cst_31 : f32 to vector<16x1xf32>
    %59 = vector.shape_cast %57 : vector<1x256xi1> to vector<1x256xi1>
    %60 = vector.broadcast %59 : vector<1x256xi1> to vector<16x256xi1>
    %61 = vector.shape_cast %55 : vector<16x1xf32> to vector<16x1xf32>
    %62 = vector.broadcast %61 : vector<16x1xf32> to vector<16x256xf32>
    %63 = vector.shape_cast %58 : vector<16x1xf32> to vector<16x1xf32>
    %64 = vector.broadcast %63 : vector<16x1xf32> to vector<16x256xf32>
    %65 = arith.select %60, %62, %64 : vector<16x256xi1>, vector<16x256xf32>
    %66 = vector.extract_strided_slice %12 {offsets = [0, 4], sizes = [16, 1], strides = [1, 1]} : vector<16x9xf32> to vector<16x1xf32>
    %67 = vector.extract_strided_slice %12 {offsets = [0, 5], sizes = [16, 1], strides = [1, 1]} : vector<16x9xf32> to vector<16x1xf32>
    %c15_i32_32 = arith.constant 15 : i32
    %68 = vector.broadcast %c15_i32_32 : i32 to vector<1x256xi32>
    %69 = arith.cmpi slt, %15, %68 : vector<1x256xi32>
    %cst_33 = arith.constant 0.000000e+00 : f32
    %70 = vector.broadcast %cst_33 : f32 to vector<16x1xf32>
    %71 = vector.shape_cast %69 : vector<1x256xi1> to vector<1x256xi1>
    %72 = vector.broadcast %71 : vector<1x256xi1> to vector<16x256xi1>
    %73 = vector.shape_cast %67 : vector<16x1xf32> to vector<16x1xf32>
    %74 = vector.broadcast %73 : vector<16x1xf32> to vector<16x256xf32>
    %75 = vector.shape_cast %70 : vector<16x1xf32> to vector<16x1xf32>
    %76 = vector.broadcast %75 : vector<16x1xf32> to vector<16x256xf32>
    %77 = arith.select %72, %74, %76 : vector<16x256xi1>, vector<16x256xf32>
    %78 = vector.extract_strided_slice %12 {offsets = [0, 6], sizes = [16, 1], strides = [1, 1]} : vector<16x9xf32> to vector<16x1xf32>
    %c240_i32 = arith.constant 240 : i32
    %79 = vector.broadcast %c240_i32 : i32 to vector<1x256xi32>
    %80 = arith.cmpi slt, %13, %79 : vector<1x256xi32>
    %c1_i32_34 = arith.constant 1 : i32
    %81 = vector.broadcast %c1_i32_34 : i32 to vector<1x256xi32>
    %82 = arith.cmpi sge, %15, %81 : vector<1x256xi32>
    %83 = arith.andi %80, %82 : vector<1x256xi1>
    %cst_35 = arith.constant 0.000000e+00 : f32
    %84 = vector.broadcast %cst_35 : f32 to vector<16x1xf32>
    %85 = vector.shape_cast %83 : vector<1x256xi1> to vector<1x256xi1>
    %86 = vector.broadcast %85 : vector<1x256xi1> to vector<16x256xi1>
    %87 = vector.shape_cast %78 : vector<16x1xf32> to vector<16x1xf32>
    %88 = vector.broadcast %87 : vector<16x1xf32> to vector<16x256xf32>
    %89 = vector.shape_cast %84 : vector<16x1xf32> to vector<16x1xf32>
    %90 = vector.broadcast %89 : vector<16x1xf32> to vector<16x256xf32>
    %91 = arith.select %86, %88, %90 : vector<16x256xi1>, vector<16x256xf32>
    %92 = vector.extract_strided_slice %12 {offsets = [0, 7], sizes = [16, 1], strides = [1, 1]} : vector<16x9xf32> to vector<16x1xf32>
    %c240_i32_36 = arith.constant 240 : i32
    %93 = vector.broadcast %c240_i32_36 : i32 to vector<1x256xi32>
    %94 = arith.cmpi slt, %13, %93 : vector<1x256xi32>
    %cst_37 = arith.constant 0.000000e+00 : f32
    %95 = vector.broadcast %cst_37 : f32 to vector<16x1xf32>
    %96 = vector.shape_cast %94 : vector<1x256xi1> to vector<1x256xi1>
    %97 = vector.broadcast %96 : vector<1x256xi1> to vector<16x256xi1>
    %98 = vector.shape_cast %92 : vector<16x1xf32> to vector<16x1xf32>
    %99 = vector.broadcast %98 : vector<16x1xf32> to vector<16x256xf32>
    %100 = vector.shape_cast %95 : vector<16x1xf32> to vector<16x1xf32>
    %101 = vector.broadcast %100 : vector<16x1xf32> to vector<16x256xf32>
    %102 = arith.select %97, %99, %101 : vector<16x256xi1>, vector<16x256xf32>
    %103 = vector.extract_strided_slice %12 {offsets = [0, 8], sizes = [16, 1], strides = [1, 1]} : vector<16x9xf32> to vector<16x1xf32>
    %c240_i32_38 = arith.constant 240 : i32
    %104 = vector.broadcast %c240_i32_38 : i32 to vector<1x256xi32>
    %105 = arith.cmpi slt, %13, %104 : vector<1x256xi32>
    %c15_i32_39 = arith.constant 15 : i32
    %106 = vector.broadcast %c15_i32_39 : i32 to vector<1x256xi32>
    %107 = arith.cmpi slt, %15, %106 : vector<1x256xi32>
    %108 = arith.andi %105, %107 : vector<1x256xi1>
    %cst_40 = arith.constant 0.000000e+00 : f32
    %109 = vector.broadcast %cst_40 : f32 to vector<16x1xf32>
    %110 = vector.shape_cast %108 : vector<1x256xi1> to vector<1x256xi1>
    %111 = vector.broadcast %110 : vector<1x256xi1> to vector<16x256xi1>
    %112 = vector.shape_cast %103 : vector<16x1xf32> to vector<16x1xf32>
    %113 = vector.broadcast %112 : vector<16x1xf32> to vector<16x256xf32>
    %114 = vector.shape_cast %109 : vector<16x1xf32> to vector<16x1xf32>
    %115 = vector.broadcast %114 : vector<16x1xf32> to vector<16x256xf32>
    %116 = arith.select %111, %113, %115 : vector<16x256xi1>, vector<16x256xf32>
    %c0_i32 = arith.constant 0 : i32
    %117 = arith.index_cast %c0_i32 : i32 to index
    %c0_41 = arith.constant 0 : index
    %c0_42 = arith.constant 0 : index
    %118 = vector.load %arg1[%117, %c0_41, %c0_42] : memref<1x4x256xf32, #tpu.memory_space<vmem>>, vector<1x4x256xf32>
    %119 = vector.shape_cast %118 : vector<1x4x256xf32> to vector<4x256xf32>
    %cst_43 = arith.constant dense<0.000000e+00> : vector<16x256xf32>
    %120 = tpu.matmul %0, %119, %cst_43 {dimension_numbers = #tpu.dot_dimension_numbers<[1], [0], [0], [1], [0, 0, 1, 1], [], []>} : vector<16x4xf32>, vector<4x256xf32>, vector<16x256xf32> -> vector<16x256xf32>
    %121 = vector.broadcast %1 : vector<16x1xf32> to vector<16x256xf32>
    %122 = arith.mulf %120, %121 : vector<16x256xf32>
    %123 = vector.broadcast %2 : vector<16x1xf32> to vector<16x256xf32>
    %124 = arith.addf %122, %123 : vector<16x256xf32>
    %cst_44 = arith.constant 0.000000e+00 : f32
    %cst_45 = arith.constant 6.000000e+00 : f32
    %125 = vector.broadcast %cst_44 : f32 to vector<16x256xf32>
    %126 = arith.maximumf %125, %124 : vector<16x256xf32>
    %127 = vector.broadcast %cst_45 : f32 to vector<16x256xf32>
    %128 = arith.minimumf %127, %126 : vector<16x256xf32>
    %c17_i32 = arith.constant 17 : i32
    %129 = tpu.dynamic_rotate %128 by %c17_i32 dim 1 : vector<16x256xf32>, i32 -> vector<16x256xf32>
    %130 = arith.mulf %129, %29 : vector<16x256xf32>
    %c16_i32_46 = arith.constant 16 : i32
    %131 = tpu.dynamic_rotate %128 by %c16_i32_46 dim 1 : vector<16x256xf32>, i32 -> vector<16x256xf32>
    %132 = arith.mulf %131, %40 : vector<16x256xf32>
    %133 = arith.addf %130, %132 : vector<16x256xf32>
    %c15_i32_47 = arith.constant 15 : i32
    %134 = tpu.dynamic_rotate %128 by %c15_i32_47 dim 1 : vector<16x256xf32>, i32 -> vector<16x256xf32>
    %135 = arith.mulf %134, %54 : vector<16x256xf32>
    %136 = arith.addf %133, %135 : vector<16x256xf32>
    %c1_i32_48 = arith.constant 1 : i32
    %137 = tpu.dynamic_rotate %128 by %c1_i32_48 dim 1 : vector<16x256xf32>, i32 -> vector<16x256xf32>
    %138 = arith.mulf %137, %65 : vector<16x256xf32>
    %139 = arith.addf %136, %138 : vector<16x256xf32>
    %140 = vector.broadcast %66 : vector<16x1xf32> to vector<16x256xf32>
    %141 = arith.mulf %128, %140 : vector<16x256xf32>
    %142 = arith.addf %139, %141 : vector<16x256xf32>
    %c255_i32 = arith.constant 255 : i32
    %143 = tpu.dynamic_rotate %128 by %c255_i32 dim 1 : vector<16x256xf32>, i32 -> vector<16x256xf32>
    %144 = arith.mulf %143, %77 : vector<16x256xf32>
    %145 = arith.addf %142, %144 : vector<16x256xf32>
    %c241_i32 = arith.constant 241 : i32
    %146 = tpu.dynamic_rotate %128 by %c241_i32 dim 1 : vector<16x256xf32>, i32 -> vector<16x256xf32>
    %147 = arith.mulf %146, %91 : vector<16x256xf32>
    %148 = arith.addf %145, %147 : vector<16x256xf32>
    %c240_i32_49 = arith.constant 240 : i32
    %149 = tpu.dynamic_rotate %128 by %c240_i32_49 dim 1 : vector<16x256xf32>, i32 -> vector<16x256xf32>
    %150 = arith.mulf %149, %102 : vector<16x256xf32>
    %151 = arith.addf %148, %150 : vector<16x256xf32>
    %c239_i32 = arith.constant 239 : i32
    %152 = tpu.dynamic_rotate %128 by %c239_i32 dim 1 : vector<16x256xf32>, i32 -> vector<16x256xf32>
    %153 = arith.mulf %152, %116 : vector<16x256xf32>
    %154 = arith.addf %151, %153 : vector<16x256xf32>
    %155 = vector.broadcast %3 : vector<16x1xf32> to vector<16x256xf32>
    %156 = arith.mulf %154, %155 : vector<16x256xf32>
    %157 = vector.broadcast %4 : vector<16x1xf32> to vector<16x256xf32>
    %158 = arith.addf %156, %157 : vector<16x256xf32>
    %cst_50 = arith.constant 0.000000e+00 : f32
    %cst_51 = arith.constant 6.000000e+00 : f32
    %159 = vector.broadcast %cst_50 : f32 to vector<16x256xf32>
    %160 = arith.maximumf %159, %158 : vector<16x256xf32>
    %161 = vector.broadcast %cst_51 : f32 to vector<16x256xf32>
    %162 = arith.minimumf %161, %160 : vector<16x256xf32>
    %cst_52 = arith.constant dense<0.000000e+00> : vector<16xf32>
    %163 = vector.multi_reduction <add>, %162, %cst_52 [1] : vector<16x256xf32> to vector<16xf32>
    %164 = vector.shape_cast %163 : vector<16xf32> to vector<16x1xf32>
    %cst_53 = arith.constant 3.906250e-03 : f32
    %165 = vector.broadcast %cst_53 : f32 to vector<16x1xf32>
    %166 = arith.mulf %164, %165 : vector<16x1xf32>
    %167 = vector.broadcast %166 : vector<16x1xf32> to vector<16x4xf32>
    %168 = arith.mulf %167, %5 : vector<16x4xf32>
    %cst_54 = arith.constant dense<0.000000e+00> : vector<4xf32>
    %169 = vector.multi_reduction <add>, %168, %cst_54 [0] : vector<16x4xf32> to vector<4xf32>
    %170 = vector.shape_cast %169 : vector<4xf32> to vector<1x4xf32>
    %171 = arith.addf %170, %6 : vector<1x4xf32>
    %cst_55 = arith.constant 0.000000e+00 : f32
    %cst_56 = arith.constant 6.000000e+00 : f32
    %172 = vector.broadcast %cst_55 : f32 to vector<1x4xf32>
    %173 = arith.maximumf %172, %171 : vector<1x4xf32>
    %174 = vector.broadcast %cst_56 : f32 to vector<1x4xf32>
    %175 = arith.minimumf %174, %173 : vector<1x4xf32>
    %176 = vector.broadcast %175 : vector<1x4xf32> to vector<16x4xf32>
    %177 = arith.mulf %176, %7 : vector<16x4xf32>
    %cst_57 = arith.constant dense<0.000000e+00> : vector<16xf32>
    %178 = vector.multi_reduction <add>, %177, %cst_57 [1] : vector<16x4xf32> to vector<16xf32>
    %179 = vector.shape_cast %178 : vector<16xf32> to vector<16x1xf32>
    %180 = arith.addf %179, %8 : vector<16x1xf32>
    %181 = arith.negf %180 : vector<16x1xf32>
    %182 = math.exp %181 : vector<16x1xf32>
    %cst_58 = arith.constant 1.000000e+00 : f32
    %183 = vector.broadcast %cst_58 : f32 to vector<16x1xf32>
    %184 = arith.addf %183, %182 : vector<16x1xf32>
    %185 = arith.divf %183, %184 : vector<16x1xf32>
    %186 = vector.broadcast %185 : vector<16x1xf32> to vector<16x256xf32>
    %187 = arith.mulf %162, %186 : vector<16x256xf32>
    %cst_59 = arith.constant dense<0.000000e+00> : vector<4x256xf32>
    %188 = tpu.matmul %9, %187, %cst_59 {dimension_numbers = #tpu.dot_dimension_numbers<[1], [0], [0], [1], [0, 0, 1, 1], [], []>} : vector<4x16xf32>, vector<16x256xf32>, vector<4x256xf32> -> vector<4x256xf32>
    %189 = vector.broadcast %10 : vector<4x1xf32> to vector<4x256xf32>
    %190 = arith.mulf %188, %189 : vector<4x256xf32>
    %191 = vector.broadcast %11 : vector<4x1xf32> to vector<4x256xf32>
    %192 = arith.addf %190, %191 : vector<4x256xf32>
    %193 = arith.addf %192, %119 : vector<4x256xf32>
    %194 = arith.index_cast %c0_i32 : i32 to index
    %c0_60 = arith.constant 0 : index
    %c0_61 = arith.constant 0 : index
    %195 = vector.load %arg15[%194, %c0_60, %c0_61] : memref<1x4x256xf32, #tpu.memory_space<vmem>>, vector<1x4x256xf32>
    %196 = vector.shape_cast %195 : vector<1x4x256xf32> to vector<4x256xf32>
    %197 = vector.shape_cast %193 : vector<4x256xf32> to vector<1x4x256xf32>
    tpu.vector_store %arg15[%194, %c0_60, %c0_61], %197 {strides = array<i32>} : memref<1x4x256xf32, #tpu.memory_space<vmem>>, vector<1x4x256xf32>,
    %c1_i32_62 = arith.constant 1 : i32
    return
  }
  func.func @transform_0(%arg0: i32) -> (i32, i32, i32) {
    %c0_i32 = arith.constant 0 : i32
    %c0_i32_0 = arith.constant 0 : i32
    %c0_i32_1 = arith.constant 0 : i32
    return %arg0, %c0_i32, %c0_i32_0 : i32, i32, i32
  }
  func.func @transform_1(%arg0: i32) -> (i32, i32) {
    %c0_i32 = arith.constant 0 : i32
    %c0_i32_0 = arith.constant 0 : i32
    %c0_i32_1 = arith.constant 0 : i32
    return %c0_i32, %c0_i32_0 : i32, i32
  }
  func.func @transform_2(%arg0: i32) -> (i32, i32) {
    %c0_i32 = arith.constant 0 : i32
    %c0_i32_0 = arith.constant 0 : i32
    %c0_i32_1 = arith.constant 0 : i32
    return %c0_i32, %c0_i32_0 : i32, i32
  }
  func.func @transform_3(%arg0: i32) -> (i32, i32) {
    %c0_i32 = arith.constant 0 : i32
    %c0_i32_0 = arith.constant 0 : i32
    %c0_i32_1 = arith.constant 0 : i32
    return %c0_i32, %c0_i32_0 : i32, i32
  }
  func.func @transform_4(%arg0: i32) -> (i32, i32) {
    %c0_i32 = arith.constant 0 : i32
    %c0_i32_0 = arith.constant 0 : i32
    %c0_i32_1 = arith.constant 0 : i32
    return %c0_i32, %c0_i32_0 : i32, i32
  }
  func.func @transform_5(%arg0: i32) -> (i32, i32) {
    %c0_i32 = arith.constant 0 : i32
    %c0_i32_0 = arith.constant 0 : i32
    %c0_i32_1 = arith.constant 0 : i32
    return %c0_i32, %c0_i32_0 : i32, i32
  }
  func.func @transform_6(%arg0: i32) -> (i32, i32) {
    %c0_i32 = arith.constant 0 : i32
    %c0_i32_0 = arith.constant 0 : i32
    %c0_i32_1 = arith.constant 0 : i32
    return %c0_i32, %c0_i32_0 : i32, i32
  }
  func.func @transform_7(%arg0: i32) -> (i32, i32) {
    %c0_i32 = arith.constant 0 : i32
    %c0_i32_0 = arith.constant 0 : i32
    %c0_i32_1 = arith.constant 0 : i32
    return %c0_i32, %c0_i32_0 : i32, i32
  }
  func.func @transform_8(%arg0: i32) -> (i32, i32) {
    %c0_i32 = arith.constant 0 : i32
    %c0_i32_0 = arith.constant 0 : i32
    %c0_i32_1 = arith.constant 0 : i32
    return %c0_i32, %c0_i32_0 : i32, i32
  }
  func.func @transform_9(%arg0: i32) -> (i32, i32) {
    %c0_i32 = arith.constant 0 : i32
    %c0_i32_0 = arith.constant 0 : i32
    %c0_i32_1 = arith.constant 0 : i32
    return %c0_i32, %c0_i32_0 : i32, i32
  }
  func.func @transform_10(%arg0: i32) -> (i32, i32) {
    %c0_i32 = arith.constant 0 : i32
    %c0_i32_0 = arith.constant 0 : i32
    %c0_i32_1 = arith.constant 0 : i32
    return %c0_i32, %c0_i32_0 : i32, i32
  }
  func.func @transform_11(%arg0: i32) -> (i32, i32) {
    %c0_i32 = arith.constant 0 : i32
    %c0_i32_0 = arith.constant 0 : i32
    %c0_i32_1 = arith.constant 0 : i32
    return %c0_i32, %c0_i32_0 : i32, i32
  }
  func.func @transform_12(%arg0: i32) -> (i32, i32) {
    %c0_i32 = arith.constant 0 : i32
    %c0_i32_0 = arith.constant 0 : i32
    %c0_i32_1 = arith.constant 0 : i32
    return %c0_i32, %c0_i32_0 : i32, i32
  }
  func.func @transform_13(%arg0: i32) -> (i32, i32) {
    %c0_i32 = arith.constant 0 : i32
    %c0_i32_0 = arith.constant 0 : i32
    %c0_i32_1 = arith.constant 0 : i32
    return %c0_i32, %c0_i32_0 : i32, i32
  }
  func.func @transform_14(%arg0: i32) -> (i32, i32, i32) {
    %c0_i32 = arith.constant 0 : i32
    %c0_i32_0 = arith.constant 0 : i32
    %c0_i32_1 = arith.constant 0 : i32
    return %arg0, %c0_i32, %c0_i32_0 : i32, i32, i32
  }
}

</mosaic_0001>

<bundles_post_ra>
// kernel: inverted_residual_se.1
= control target key start
LH: loop header
LB: loop body
LE: loop exit
PB: predicated region body
PF: predicated region fallthrough
CT: control target
= control target key end

     0   :  { %s3261_s0 = inlined_call_operand.hbm [shape: f32[2,4,256], index: 0, kind: input, shape index: {}]   ;;  %s3262_s1 = inlined_call_operand.hbm [shape: f32[16,4], index: 1, kind: input, shape index: {}]   ;;  %s3263_s2 = inlined_call_operand.hbm [shape: f32[16,1], index: 2, kind: input, shape index: {}]   ;;  %s3264_s3 = inlined_call_operand.hbm [shape: f32[16,1], index: 3, kind: input, shape index: {}]   ;;  %s3265_s4 = inlined_call_operand.hbm [shape: f32[16,9], index: 4, kind: input, shape index: {}]   ;;  %s3266_s5 = inlined_call_operand.hbm [shape: f32[16,1], index: 5, kind: input, shape index: {}]   ;;  %s3267_s6 = inlined_call_operand.hbm [shape: f32[16,1], index: 6, kind: input, shape index: {}]   ;;  %s3268_s7 = inlined_call_operand.hbm [shape: f32[16,4], index: 7, kind: input, shape index: {}]   ;;  %s3269_s8 = inlined_call_operand.hbm [shape: f32[1,4], index: 8, kind: input, shape index: {}]   ;;  %s3270_s9 = inlined_call_operand.hbm [shape: f32[16,4], index: 9, kind: input, shape index: {}]   ;;  %s3271_s10 = inlined_call_operand.hbm [shape: f32[16,1], index: 10, kind: input, shape index: {}]   ;;  %s3272_s11 = inlined_call_operand.hbm [shape: f32[4,16], index: 11, kind: input, shape index: {}]   ;;  %s3273_s12 = inlined_call_operand.hbm [shape: f32[4,1], index: 12, kind: input, shape index: {}]   ;;  %s3274_s13 = inlined_call_operand.hbm [shape: f32[4,1], index: 13, kind: input, shape index: {}]   ;;  %s3275_s14 = inlined_call_operand.hbm [shape: f32[2,4,256], index: 14, kind: output, shape index: {}]  }
   0x1   :  { %3287 = sst [smem:[#allocation39_spill]] %s3261_s0 }
   0x2   :  { %3288 = sst [smem:[#allocation40_spill]] %s3262_s1 }
   0x3   :  { %3289 = sst [smem:[#allocation41_spill]] %s3263_s2 }
   0x4   :  { %3290 = sst [smem:[#allocation42_spill]] %s3264_s3 }
   0x5   :  { %3291 = sst [smem:[#allocation43_spill]] %s3275_s14 }
   0x6   :  { %19 = vsyncpa [#allocation3], 0 }
   0x7   :  { %21 = vsyncpa [#allocation3 + $0x1], 0 }
   0x8   :  { %22 = vsyncpa [#allocation6], 0 }
   0x9   :  { %23 = vsyncpa [#allocation9], 0 }
   0xa   :  { %24 = vsyncpa [#allocation12], 0 }
   0xb   :  { %25 = vsyncpa [#allocation15], 0 }
   0xc   :  { %26 = vsyncpa [#allocation18], 0 }
   0xd   :  { %27 = vsyncpa [#allocation21], 0 }
   0xe   :  { %28 = vsyncpa [#allocation24], 0 }
   0xf   :  { %29 = vsyncpa [#allocation4], 0 }
  0x10   :  { %31 = vsyncpa [#allocation4 + $0x1], 0  ;;  %s2427_s29 = smov 0   ;;  %s2429_s30 = smov 0  }
  0x11   :  { %s2431_s15 = smov 0   ;;  %s2433_s16 = smov 0  }
  0x12 LB: > { %3292 = sst [smem:[#allocation35_spill]] %s2303_s29  ;;  %s2317_s17 = smov [#allocation5]   ;;  %s2315_s16 = sphi %s2433_s16, %s3358_s16   ;;  %s2311_s15 = sphi %s2431_s15, %s3357_s15   ;;  %s2307_s30 = sphi %s2429_s30, %s3356_s30   ;;  %s2303_s29 = sphi %s2427_s29, %s3355_s29  }
  0x13   : > { %3293 = sst [smem:[#allocation36_spill]] %s2307_s30  ;;  %s379_s18 = sshll.u32 %s2317_s17, 4  ;;  %s2453_s18 = int_to_ptr.vmem [resolvable:$true] %s379_s18 }
  0x14   : > { %s2448_s19 = sadd.s32 4294967295, %s2315_s16   ;;  %p1551_p0 = scmp.ge.s32.totalorder %s2315_s16, 1 }
  0x15   : > { %3294 = sst [smem:[#allocation37_spill]] %s2448_s19  ;;  %p3283_p1 = scmp.eq.s32.totalorder %s2448_s19, 0 }
  0x16   : > { %p367_p2 = scmp.lt.s32.totalorder %s2315_s16, 3  ;;  %s2318_s21 = smov [#allocation8]  }
  0x17   : > { %s405_s22 = sshll.u32 %s2318_s21, 4  ;;  %s2319_s24 = smov [#allocation11]   ;;  %s2468_s22 = int_to_ptr.vmem [resolvable:$true] %s405_s22 }
  0x18   : > { %p2455_p3 = pnand %p1551_p0, %p367_p2  ;;  %s431_s25 = sshll.u32 %s2319_s24, 4  ;;  %s2470_s25 = int_to_ptr.vmem [resolvable:$true] %s431_s25 }
  0x19   : > { %s3298_s1 = sld [smem:[#allocation40_spill]] }
  0x1a   : > { %s3295_s20 = scalar_select %p2455_p3, 1, 0 }
  0x1b   : > { %p1659_p5 = pneg %p2455_p3 }
  0x1c   : > { %3296 = sst [smem:[#allocation38_spill]] %s3295_s20 }
  0x1d   : > { %p2464_p6 = pnand %p1659_p5, %p3283_p1 }
  0x1f   : > { %s1827_s28 = scalar_lea.hbm %s3298_s1, 256  ;;  %p2480_p8 = pneg %p2464_p6 }
  0x20   : > { %p1828_p7 = scmp.ne.s32.totalorder %s3298_s1, %s1827_s28  ;;  %p1834_p11 = scmp.lt.u32.totalorder %s1827_s28, %s3298_s1 }
  0x22   : > { %p1830_p9 = pnand %p2480_p8, %p1828_p7 }
  0x24   : > { %p1831_p10 = pneg %p1830_p9 }
  0x26   : > { %p1836_p12 = pnand %p1834_p11, %p1831_p10 }
  0x28   : > { %1839 = shalt.err (!%p1836_p12)
}
  0x29   : > { %s1840_s14 = scalar_lea.vmem %s2453_s18, 256  ;;  %p1848_p5 = scmp.lt.s32.totalorder %s2453_s18, %s2453_s18 }
  0x2a   : > { %p1841_p13 = scmp.ne.s32.totalorder %s2453_s18, %s1840_s14  ;;  %p1849_p4 = scmp.lt.s32.totalorder %s1840_s14, %s1840_s14 }
  0x2c   : > { %p1843_p0 = pnand %p1841_p13, %p2480_p8  ;;  %p1850_p7 = por %p1849_p4, %p1848_p5 }
  0x2e   : > { %p1844_p2 = pneg %p1843_p0 }
  0x30   : > { %p1851_p9 = pnand %p1850_p7, %p1844_p2 }
  0x32   : > { %1854 = shalt.err (!%p1851_p9)
}
  0x33   : > { %s2320_s26 = smov 128   ;;  %s2321_s20 = smov 8  }
  0x34   : > { %1662 = dma.hbm_to_vmem [thread:$0]  (!%p2464_p6), %s3298_s1, 256, %s2453_s18, [#allocation6], %s2320_s26, %s2320_s26, %s2321_s20  }
  0x35   : > { %s3300_s3 = sld [smem:[#allocation42_spill]] }
  0x3b   : > { %s1855_s14 = scalar_lea.hbm %s3300_s3, 256 }
  0x3c   : > { %p1856_p4 = scmp.ne.s32.totalorder %s3300_s3, %s1855_s14  ;;  %p1862_p12 = scmp.lt.u32.totalorder %s1855_s14, %s3300_s3 }
  0x3e   : > { %p1858_p10 = pnand %p1856_p4, %p2480_p8 }
  0x40   : > { %p1859_p11 = pneg %p1858_p10 }
  0x42   : > { %p1864_p13 = pnand %p1862_p12, %p1859_p11 }
  0x44   : > { %1867 = shalt.err (!%p1864_p13)
}
  0x45   : > { %s1868_s18 = scalar_lea.vmem %s2468_s22, 256  ;;  %p1876_p7 = scmp.lt.s32.totalorder %s2468_s22, %s2468_s22 }
  0x46   : > { %p1869_p0 = scmp.ne.s32.totalorder %s2468_s22, %s1868_s18  ;;  %p1877_p9 = scmp.lt.s32.totalorder %s1868_s18, %s1868_s18 }
  0x48   : > { %p1871_p2 = pnand %p1869_p0, %p2480_p8  ;;  %p1878_p4 = por %p1877_p9, %p1876_p7 }
  0x4a   : > { %p1872_p5 = pneg %p1871_p2 }
  0x4c   : > { %p1879_p10 = pnand %p1878_p4, %p1872_p5 }
  0x4e   : > { %1882 = shalt.err (!%p1879_p10)
}
  0x4f   : > { %1668 = dma.hbm_to_vmem [thread:$0]  (!%p2464_p6), %s3300_s3, 256, %s2468_s22, [#allocation9], %s2320_s26, %s2320_s26, %s2321_s20  }
  0x50   : > { %s1883_s27 = scalar_lea.hbm %s3266_s5, 256 }
  0x51   : > { %p1884_p11 = scmp.ne.s32.totalorder %s3266_s5, %s1883_s27  ;;  %p1890_p0 = scmp.lt.u32.totalorder %s1883_s27, %s3266_s5 }
  0x53   : > { %p1886_p12 = pnand %p1884_p11, %p2480_p8 }
  0x55   : > { %p1887_p13 = pneg %p1886_p12 }
  0x57   : > { %p1892_p2 = pnand %p1890_p0, %p1887_p13 }
  0x59   : > { %1895 = shalt.err (!%p1892_p2)
}
  0x5a   : > { %s1896_s22 = scalar_lea.vmem %s2470_s25, 256  ;;  %p1904_p4 = scmp.lt.s32.totalorder %s2470_s25, %s2470_s25 }
  0x5b   : > { %p1897_p5 = scmp.ne.s32.totalorder %s2470_s25, %s1896_s22  ;;  %p1905_p10 = scmp.lt.s32.totalorder %s1896_s22, %s1896_s22 }
  0x5d   : > { %p1899_p7 = pnand %p1897_p5, %p2480_p8  ;;  %p1906_p11 = por %p1905_p10, %p1904_p4 }
  0x5f   : > { %p1900_p9 = pneg %p1899_p7 }
  0x61   : > { %p1907_p12 = pnand %p1906_p11, %p1900_p9 }
  0x63   : > { %1910 = shalt.err (!%p1907_p12)
}
  0x64   : > { %1674 = dma.hbm_to_vmem [thread:$0]  (!%p2464_p6), %s3266_s5, 256, %s2470_s25, [#allocation12], %s2320_s26, %s2320_s26, %s2321_s20  }
  0x65   : > { %s2322_s29 = smov [#allocation14]   ;;  %s2323_s19 = smov [#allocation17]  }
  0x66   : > { %s457_s30 = sshll.u32 %s2322_s29, 4  ;;  %s481_s27 = sshll.u32 %s2323_s19, 4  ;;  %s458_s30 = int_to_ptr.vmem [resolvable:$true] %s457_s30  ;;  %s482_s27 = int_to_ptr.vmem [resolvable:$true] %s481_s27 }
  0x67   : > { %s1911_s24 = scalar_lea.hbm %s3268_s7, 256 }
  0x68   : > { %p1912_p13 = scmp.ne.s32.totalorder %s3268_s7, %s1911_s24  ;;  %p1918_p5 = scmp.lt.u32.totalorder %s1911_s24, %s3268_s7 }
  0x6a   : > { %p1914_p0 = pnand %p1912_p13, %p2480_p8 }
  0x6c   : > { %p1915_p2 = pneg %p1914_p0 }
  0x6e   : > { %p1920_p7 = pnand %p1918_p5, %p1915_p2 }
  0x70   : > { %1923 = shalt.err (!%p1920_p7)
}
  0x71   : > { %s1924_s25 = scalar_lea.vmem %s458_s30, 256  ;;  %p1932_p11 = scmp.lt.s32.totalorder %s458_s30, %s458_s30 }
  0x72   : > { %p1925_p9 = scmp.ne.s32.totalorder %s458_s30, %s1924_s25  ;;  %p1933_p12 = scmp.lt.s32.totalorder %s1924_s25, %s1924_s25 }
  0x74   : > { %p1927_p4 = pnand %p1925_p9, %p2480_p8  ;;  %p1934_p1 = por %p1933_p12, %p1932_p11 }
  0x76   : > { %p1928_p10 = pneg %p1927_p4 }
  0x78   : > { %p1935_p3 = pnand %p1934_p1, %p1928_p10 }
  0x7a   : > { %1938 = shalt.err (!%p1935_p3)
}
  0x7b   : > { %1680 = dma.hbm_to_vmem [thread:$0]  (!%p2464_p6), %s3268_s7, 256, %s458_s30, [#allocation15], %s2320_s26, %s2320_s26, %s2321_s20  }
  0x7c   : > { %s1939_s28 = scalar_lea.hbm %s3270_s9, 256 }
  0x7d   : > { %p1940_p1 = scmp.ne.s32.totalorder %s3270_s9, %s1939_s28  ;;  %p1946_p0 = scmp.lt.u32.totalorder %s1939_s28, %s3270_s9 }
  0x7f   : > { %p1942_p3 = pnand %p1940_p1, %p2480_p8 }
  0x81   : > { %p1943_p13 = pneg %p1942_p3 }
  0x83   : > { %p1948_p2 = pnand %p1946_p0, %p1943_p13 }
  0x85   : > { %1951 = shalt.err (!%p1948_p2)
}
  0x86   : > { %s1952_s18 = scalar_lea.vmem %s482_s27, 256  ;;  %p1960_p4 = scmp.lt.s32.totalorder %s482_s27, %s482_s27 }
  0x87   : > { %p1953_p5 = scmp.ne.s32.totalorder %s482_s27, %s1952_s18  ;;  %p1961_p10 = scmp.lt.s32.totalorder %s1952_s18, %s1952_s18 }
  0x89   : > { %p1955_p7 = pnand %p1953_p5, %p2480_p8  ;;  %p1962_p11 = por %p1961_p10, %p1960_p4 }
  0x8b   : > { %p1956_p9 = pneg %p1955_p7 }
  0x8d   : > { %p1963_p12 = pnand %p1962_p11, %p1956_p9 }
  0x8f   : > { %1966 = shalt.err (!%p1963_p12)
}
  0x90   : > { %1686 = dma.hbm_to_vmem [thread:$0]  (!%p2464_p6), %s3270_s9, 256, %s482_s27, [#allocation18], %s2320_s26, %s2320_s26, %s2321_s20  }
  0x91   : > { %s2324_s1 = smov [#allocation20]   ;;  %s2325_s29 = smov [#allocation7]  }
  0x92   : > { %s508_s0 = sshll.u32 %s2324_s1, 4  ;;  %s392_s19 = sshll.u32 %s2325_s29, 4  ;;  %s509_s0 = int_to_ptr.vmem [resolvable:$true] %s508_s0  ;;  %s393_s19 = int_to_ptr.vmem [resolvable:$true] %s392_s19 }
  0x93   : > { %s1967_s24 = scalar_lea.hbm %s3272_s11, 64 }
  0x94   : > { %p1968_p1 = scmp.ne.s32.totalorder %s3272_s11, %s1967_s24  ;;  %p1974_p0 = scmp.lt.u32.totalorder %s1967_s24, %s3272_s11 }
  0x96   : > { %p1970_p3 = pnand %p1968_p1, %p2480_p8 }
  0x98   : > { %p1971_p13 = pneg %p1970_p3 }
  0x9a   : > { %p1976_p2 = pnand %p1974_p0, %p1971_p13 }
  0x9c   : > { %1979 = shalt.err (!%p1976_p2)
}
  0x9d   : > { %s1980_s27 = scalar_lea.vmem %s509_s0, 64  ;;  %p1988_p4 = scmp.lt.s32.totalorder %s509_s0, %s509_s0 }
  0x9e   : > { %p1981_p5 = scmp.ne.s32.totalorder %s509_s0, %s1980_s27  ;;  %p1989_p10 = scmp.lt.s32.totalorder %s1980_s27, %s1980_s27 }
  0xa0   : > { %p1983_p7 = pnand %p1981_p5, %p2480_p8  ;;  %p1990_p11 = por %p1989_p10, %p1988_p4 }
  0xa2   : > { %p1984_p9 = pneg %p1983_p7 }
  0xa4   : > { %p1991_p12 = pnand %p1990_p11, %p1984_p9 }
  0xa6   : > { %1994 = shalt.err (!%p1991_p12)
}
  0xa7   : > { %1692 = dma.hbm_to_vmem [thread:$0]  (!%p2464_p6), %s3272_s11, 64, %s509_s0, [#allocation21]  }
  0xa8   : > { %s3301_s2 = sld [smem:[#allocation41_spill]] }
  0xae   : > { %s1995_s17 = scalar_lea.hbm %s3301_s2, 256 }
  0xaf   : > { %p1996_p1 = scmp.ne.s32.totalorder %s3301_s2, %s1995_s17  ;;  %p2002_p0 = scmp.lt.u32.totalorder %s1995_s17, %s3301_s2 }
  0xb1   : > { %p1998_p3 = pnand %p1996_p1, %p2480_p8 }
  0xb3   : > { %p1999_p13 = pneg %p1998_p3 }
  0xb5   : > { %p2004_p2 = pnand %p2002_p0, %p1999_p13 }
  0xb7   : > { %2007 = shalt.err (!%p2004_p2)
}
  0xb8   : > { %s2008_s30 = scalar_lea.vmem %s393_s19, 256  ;;  %p2016_p4 = scmp.lt.s32.totalorder %s393_s19, %s393_s19 }
  0xb9   : > { %p2009_p5 = scmp.ne.s32.totalorder %s393_s19, %s2008_s30  ;;  %p2017_p10 = scmp.lt.s32.totalorder %s2008_s30, %s2008_s30 }
  0xbb   : > { %p2011_p7 = pnand %p2009_p5, %p2480_p8  ;;  %p2018_p11 = por %p2017_p10, %p2016_p4 }
  0xbd   : > { %p2012_p9 = pneg %p2011_p7 }
  0xbf   : > { %p2019_p12 = pnand %p2018_p11, %p2012_p9 }
  0xc1   : > { %2022 = shalt.err (!%p2019_p12)
}
  0xc2   : > { %1665 = dma.hbm_to_vmem [thread:$0]  (!%p2464_p6), %s3301_s2, 256, %s393_s19, [#allocation6], %s2320_s26, %s2320_s26, %s2321_s20  }
  0xc3   : > { %s2326_s25 = smov [#allocation10]   ;;  %s2327_s29 = smov [#allocation13]  }
  0xc4   : > { %s418_s1 = sshll.u32 %s2326_s25, 4  ;;  %s444_s28 = sshll.u32 %s2327_s29, 4  ;;  %s419_s1 = int_to_ptr.vmem [resolvable:$true] %s418_s1  ;;  %s445_s28 = int_to_ptr.vmem [resolvable:$true] %s444_s28 }
  0xc5   : > { %s2023_s14 = scalar_lea.hbm %s3265_s4, 256 }
  0xc6   : > { %p2024_p1 = scmp.ne.s32.totalorder %s3265_s4, %s2023_s14  ;;  %p2030_p0 = scmp.lt.u32.totalorder %s2023_s14, %s3265_s4 }
  0xc8   : > { %p2026_p3 = pnand %p2024_p1, %p2480_p8 }
  0xca   : > { %p2027_p13 = pneg %p2026_p3 }
  0xcc   : > { %p2032_p2 = pnand %p2030_p0, %p2027_p13 }
  0xce   : > { %2035 = shalt.err (!%p2032_p2)
}
  0xcf   : > { %s2036_s19 = scalar_lea.vmem %s419_s1, 256  ;;  %p2044_p4 = scmp.lt.s32.totalorder %s419_s1, %s419_s1 }
  0xd0   : > { %p2037_p5 = scmp.ne.s32.totalorder %s419_s1, %s2036_s19  ;;  %p2045_p10 = scmp.lt.s32.totalorder %s2036_s19, %s2036_s19 }
  0xd2   : > { %p2039_p7 = pnand %p2037_p5, %p2480_p8  ;;  %p2046_p11 = por %p2045_p10, %p2044_p4 }
  0xd4   : > { %p2040_p9 = pneg %p2039_p7 }
  0xd6   : > { %p2047_p12 = pnand %p2046_p11, %p2040_p9 }
  0xd8   : > { %2050 = shalt.err (!%p2047_p12)
}
  0xd9   : > { %1671 = dma.hbm_to_vmem [thread:$0]  (!%p2464_p6), %s3265_s4, 256, %s419_s1, [#allocation9], %s2320_s26, %s2320_s26, %s2321_s20  }
  0xda   : > { %s2051_s24 = scalar_lea.hbm %s3267_s6, 256 }
  0xdb   : > { %p2052_p1 = scmp.ne.s32.totalorder %s3267_s6, %s2051_s24  ;;  %p2058_p0 = scmp.lt.u32.totalorder %s2051_s24, %s3267_s6 }
  0xdd   : > { %p2054_p3 = pnand %p2052_p1, %p2480_p8 }
  0xdf   : > { %p2055_p13 = pneg %p2054_p3 }
  0xe1   : > { %p2060_p2 = pnand %p2058_p0, %p2055_p13 }
  0xe3   : > { %2063 = shalt.err (!%p2060_p2)
}
  0xe4   : > { %s2064_s0 = scalar_lea.vmem %s445_s28, 256  ;;  %p2072_p4 = scmp.lt.s32.totalorder %s445_s28, %s445_s28 }
  0xe5   : > { %p2065_p5 = scmp.ne.s32.totalorder %s445_s28, %s2064_s0  ;;  %p2073_p10 = scmp.lt.s32.totalorder %s2064_s0, %s2064_s0 }
  0xe7   : > { %p2067_p7 = pnand %p2065_p5, %p2480_p8  ;;  %p2074_p11 = por %p2073_p10, %p2072_p4 }
  0xe9   : > { %p2068_p9 = pneg %p2067_p7 }
  0xeb   : > { %p2075_p12 = pnand %p2074_p11, %p2068_p9 }
  0xed   : > { %2078 = shalt.err (!%p2075_p12)
}
  0xee   : > { %1677 = dma.hbm_to_vmem [thread:$0]  (!%p2464_p6), %s3267_s6, 256, %s445_s28, [#allocation12], %s2320_s26, %s2320_s26, %s2321_s20  }
  0xef   : > { %s2328_s27 = smov [#allocation16]   ;;  %s2329_s29 = smov [#allocation19]  }
  0xf0   : > { %s471_s25 = sshll.u32 %s2328_s27, 4  ;;  %s494_s17 = sshll.u32 %s2329_s29, 4  ;;  %s472_s25 = int_to_ptr.vmem [resolvable:$true] %s471_s25  ;;  %s495_s17 = int_to_ptr.vmem [resolvable:$true] %s494_s17 }
  0xf1   : > { %s2079_s22 = scalar_lea.hbm %s3269_s8, 16 }
  0xf2   : > { %p2080_p1 = scmp.ne.s32.totalorder %s3269_s8, %s2079_s22  ;;  %p2086_p0 = scmp.lt.u32.totalorder %s2079_s22, %s3269_s8 }
  0xf4   : > { %p2082_p3 = pnand %p2080_p1, %p2480_p8 }
  0xf6   : > { %p2083_p13 = pneg %p2082_p3 }
  0xf8   : > { %p2088_p2 = pnand %p2086_p0, %p2083_p13 }
  0xfa   : > { %2091 = shalt.err (!%p2088_p2)
}
  0xfb   : > { %s2092_s28 = scalar_lea.vmem %s472_s25, 16  ;;  %s2099_s19 = scalar_lea.vmem %s472_s25, 32 }
  0xfc   : > { %p2093_p5 = scmp.ne.s32.totalorder %s472_s25, %s2092_s28  ;;  %p2100_p4 = scmp.lt.s32.totalorder %s472_s25, %s472_s25 }
  0xfd   : > { %p2101_p10 = scmp.lt.s32.totalorder %s2099_s19, %s2092_s28 }
  0xfe   : > { %p2095_p7 = pnand %p2093_p5, %p2480_p8 }
  0xff   : > { %p2102_p11 = por %p2101_p10, %p2100_p4 }
 0x100   : > { %p2096_p9 = pneg %p2095_p7 }
 0x102   : > { %p2103_p12 = pnand %p2102_p11, %p2096_p9 }
 0x104   : > { %2106 = shalt.err (!%p2103_p12)
}
 0x105   : > { %1683 = dma.hbm_to_vmem [thread:$0]  (!%p2464_p6), %s3269_s8, 16, %s472_s25, [#allocation15]  }
 0x106   : > { %s2107_s22 = scalar_lea.hbm %s3271_s10, 256 }
 0x107   : > { %p2108_p1 = scmp.ne.s32.totalorder %s3271_s10, %s2107_s22  ;;  %p2114_p0 = scmp.lt.u32.totalorder %s2107_s22, %s3271_s10 }
 0x109   : > { %p2110_p3 = pnand %p2108_p1, %p2480_p8 }
 0x10b   : > { %p2111_p13 = pneg %p2110_p3 }
 0x10d   : > { %p2116_p2 = pnand %p2114_p0, %p2111_p13 }
 0x10f   : > { %2119 = shalt.err (!%p2116_p2)
}
 0x110   : > { %s2120_s28 = scalar_lea.vmem %s495_s17, 256  ;;  %p2128_p4 = scmp.lt.s32.totalorder %s495_s17, %s495_s17 }
 0x111   : > { %p2121_p5 = scmp.ne.s32.totalorder %s495_s17, %s2120_s28  ;;  %p2129_p10 = scmp.lt.s32.totalorder %s2120_s28, %s2120_s28 }
 0x113   : > { %p2123_p7 = pnand %p2121_p5, %p2480_p8  ;;  %p2130_p11 = por %p2129_p10, %p2128_p4 }
 0x115   : > { %p2124_p9 = pneg %p2123_p7 }
 0x117   : > { %p2131_p12 = pnand %p2130_p11, %p2124_p9 }
 0x119   : > { %2134 = shalt.err (!%p2131_p12)
}
 0x11a   : > { %1689 = dma.hbm_to_vmem [thread:$0]  (!%p2464_p6), %s3271_s10, 256, %s495_s17, [#allocation18], %s2320_s26, %s2320_s26, %s2321_s20  }
 0x11b   : > { %s2330_s27 = smov [#allocation22]   ;;  %s2331_s24 = smov [#allocation23]  }
 0x11c   : > { %s519_s29 = sshll.u32 %s2330_s27, 4  ;;  %s530_s14 = sshll.u32 %s2331_s24, 4  ;;  %s520_s29 = int_to_ptr.vmem [resolvable:$true] %s519_s29  ;;  %s531_s14 = int_to_ptr.vmem [resolvable:$true] %s530_s14 }
 0x11d   : > { %s2135_s30 = scalar_lea.hbm %s3273_s12, 64 }
 0x11e   : > { %p2136_p1 = scmp.ne.s32.totalorder %s3273_s12, %s2135_s30  ;;  %p2142_p0 = scmp.lt.u32.totalorder %s2135_s30, %s3273_s12 }
 0x120   : > { %p2138_p3 = pnand %p2136_p1, %p2480_p8 }
 0x122   : > { %p2139_p13 = pneg %p2138_p3 }
 0x124   : > { %p2144_p2 = pnand %p2142_p0, %p2139_p13 }
 0x126   : > { %2147 = shalt.err (!%p2144_p2)
}
 0x127   : > { %s2148_s26 = scalar_lea.vmem %s520_s29, 64  ;;  %p2156_p4 = scmp.lt.s32.totalorder %s520_s29, %s520_s29 }
 0x128   : > { %p2149_p5 = scmp.ne.s32.totalorder %s520_s29, %s2148_s26  ;;  %p2157_p10 = scmp.lt.s32.totalorder %s2148_s26, %s2148_s26 }
 0x12a   : > { %p2151_p7 = pnand %p2149_p5, %p2480_p8  ;;  %p2158_p11 = por %p2157_p10, %p2156_p4 }
 0x12c   : > { %p2152_p9 = pneg %p2151_p7 }
 0x12e   : > { %p2159_p12 = pnand %p2158_p11, %p2152_p9 }
 0x130   : > { %2162 = shalt.err (!%p2159_p12)
}
 0x131   : > { %1695 = dma.hbm_to_vmem [thread:$0]  (!%p2464_p6), %s3273_s12, 64, %s520_s29, [#allocation21]  }
 0x132   : > { %s2163_s24 = scalar_lea.hbm %s3274_s13, 64 }
 0x133   : > { %p2164_p1 = scmp.ne.s32.totalorder %s3274_s13, %s2163_s24  ;;  %p2170_p0 = scmp.lt.u32.totalorder %s2163_s24, %s3274_s13 }
 0x135   : > { %p2166_p3 = pnand %p2164_p1, %p2480_p8 }
 0x137   : > { %p2167_p13 = pneg %p2166_p3 }
 0x139   : > { %p2172_p2 = pnand %p2170_p0, %p2167_p13 }
 0x13b   : > { %2175 = shalt.err (!%p2172_p2)
}
 0x13c   : > { %s2176_s1 = scalar_lea.vmem %s531_s14, 64  ;;  %p2184_p4 = scmp.lt.s32.totalorder %s531_s14, %s531_s14 }
 0x13d   : > { %p2177_p5 = scmp.ne.s32.totalorder %s531_s14, %s2176_s1  ;;  %p2185_p10 = scmp.lt.s32.totalorder %s2176_s1, %s2176_s1 }
 0x13f   : > { %p2179_p7 = pnand %p2177_p5, %p2480_p8  ;;  %p2186_p11 = por %p2185_p10, %p2184_p4 }
 0x141   : > { %p2180_p9 = pneg %p2179_p7 }
 0x143   : > { %p2187_p12 = pnand %p2186_p11, %p2180_p9 }
 0x145   : > { %2190 = shalt.err (!%p2187_p12)
}
 0x146   : > { %s3302_s25 = sld [smem:[#allocation36_spill]]  ;;  %s3303_s21 = sld [smem:[#allocation35_spill]] }
 0x147   : > { %s3304_s26 = sld [smem:[#allocation37_spill]]  ;;  %s1550_s20 = sadd.s32 4294967294, %s2315_s16  }
 0x148   : > { %1698 = dma.hbm_to_vmem [thread:$0]  (!%p2464_p6), %s3274_s13, 64, %s531_s14, [#allocation24]  }
 0x149   : > { %s2756_s23 = sadd.s32 1, %s2315_s16   ;;  %s44_s17 = sadd.s32 1, %s2311_s15 }
 0x14a   : > { %s41_s19 = ssub.s32 %s2315_s16, %s2756_s23  ;;  %p52_p3 = scmp.eq.s32.totalorder %s2315_s16, 0 }
 0x14b   : > { %p42_p1 = scmp.eq.s32.totalorder %s41_s19, 0  ;;  %p360_p9 = scmp.eq.s32.totalorder %s1550_s20, 1 }
 0x14c   : > { %p51_p8 = scmp.ne.s32.totalorder %s2311_s15, %s3302_s25  ;;  %p57_p13 = scmp.ne.s32.totalorder %s3302_s25, %s3303_s21 }
 0x14d   : > { %p354_p0 = scmp.eq.s32.totalorder %s3304_s26, 1  ;;  %p3305_p5 = scmp.eq.s32.totalorder %s3304_s26, 0 }
 0x14e   : > { %s2768_s27 = scalar_select %p42_p1, %s2311_s15, %s44_s17  }
 0x14f   : > { %p53_p2 = por %p52_p3, %p51_p8  ;;  %p2772_p7 = por %p3305_p5, %p57_p13 }
 0x150   : > { %p2776_p6 = por %p354_p0, %p51_p8  ;;  %p1720_p4 = scmp.lt.s32.totalorder %s2315_s16, 2 }
 0x151   : > { %s541_s22 = sand.u32 1, %s2311_s15   ;;  %p2782_p10 = por %p360_p9, %p57_p13 }
 0x152   : > { %s3307_s14 = scalar_select %p2776_p6, 1, 0 }
 0x153   : > { %s3308_s18 = scalar_select %p2782_p10, 1, 0 }
 0x154   : > { %s1566_s30 = sshll.u32 %s541_s22, 3  ;;  %s1597_s0 = sshll.u32 %s2315_s16, 7 }
 0x155   : > { %s3309_s28 = sld [smem:[#allocation39_spill]]  ;;  %s545_s21 = scalar_lea.vmem [#allocation2], %s1566_s30 }
 0x156   : > { %s553_s26 = sshll.u32 %s545_s21, 4  ;;  %p2792_p11 = pnand %p1720_p4, %p53_p2  ;;  %s2796_s26 = int_to_ptr.vmem [resolvable:$true] %s553_s26 }
 0x157   : > { %s542_s17 = scalar_lea.sflag [#allocation3], %s541_s22 }
 0x158   : > { %p2193_p8 = pneg %p2792_p11 }
 0x15b   : > { %s2790_s25 = scalar_lea.hbm %s3309_s28, %s1597_s0  ;;  %s2196_s1 = scalar_lea.hbm %s3309_s28, 256 }
 0x15c   : > { %s2191_s19 = scalar_lea.hbm %s2790_s25, 128  ;;  %p2197_p13 = scmp.lt.u32.totalorder %s2790_s25, %s3309_s28 }
 0x15d   : > { %p2192_p12 = scmp.ne.s32.totalorder %s2790_s25, %s2191_s19  ;;  %p2198_p0 = scmp.lt.u32.totalorder %s2196_s1, %s2191_s19 }
 0x15e   : > { %p2200_p5 = scmp.lt.u32.totalorder %s2191_s19, %s2790_s25 }
 0x15f   : > { %p2194_p1 = pnand %p2193_p8, %p2192_p12  ;;  %p2199_p2 = por %p2198_p0, %p2197_p13 }
 0x161   : > { %p2195_p3 = pneg %p2194_p1  ;;  %p2201_p9 = por %p2200_p5, %p2199_p2 }
 0x163   : > { %p2202_p4 = pnand %p2201_p9, %p2195_p3 }
 0x165   : > { %2205 = shalt.err (!%p2202_p4)
}
 0x166   : > { %s2206_s22 = scalar_lea.vmem %s2796_s26, 128  ;;  %s2332_s0 = smov [#allocation2]  }
 0x167   : > { %p2207_p12 = scmp.ne.s32.totalorder %s2796_s26, %s2206_s22  ;;  %s2211_s30 = sshll.u32 %s2332_s0, 4  ;;  %s2212_s30 = int_to_ptr.vmem [resolvable:$false] %s2211_s30 }
 0x168   : > { %s2213_s29 = scalar_lea.vmem %s2212_s30, 256  ;;  %p2214_p6 = scmp.lt.s32.totalorder %s2796_s26, %s2212_s30 }
 0x169   : > { %p2209_p1 = pnand %p2207_p12, %p2193_p8  ;;  %p2215_p13 = scmp.lt.s32.totalorder %s2213_s29, %s2206_s22 }
 0x16b   : > { %p2210_p10 = pneg %p2209_p1  ;;  %p2216_p0 = por %p2215_p13, %p2214_p6 }
 0x16d   : > { %p2217_p2 = pnand %p2216_p0, %p2210_p10 }
 0x16f   : > { %2220 = shalt.err (!%p2217_p2)
}
 0x170   : > { %1702 = dma.hbm_to_vmem [thread:$0]  (!%p2792_p11), %s2790_s25, 128, %s2796_s26, %s542_s17  }
 0x171   : > { %s3311_s19 = sld [smem:[#allocation38_spill]] }
 0x177   : > { %p3312_p3 = scmp.ne.s32.totalorder %s3311_s19, 0 }
 0x178   : > { %s3313_s1 = sld [smem:[#allocation36_spill]] (!%p3312_p3) }
 0x179   : > { %562 = sbr.rel (%p3312_p3) target bundleno = 1557 (0x615), region = 76 }
 0x17e   : > { %s2826_s21 = sand.u32 (!%p3312_p3), 1, %s3313_s1  }
 0x17f   : > { %s1570_s0 = sshll.u32 (!%p3312_p3), %s2826_s21, 3  ;;  %s565_s22 = scalar_lea.sflag (!%p3312_p3), [#allocation3], %s2826_s21 }
 0x180   : > { %s568_s30 = scalar_lea.vmem [#allocation2], %s1570_s0 }
 0x181   : > { %2266 = dma.done.wait (%p2772_p7), %s565_s22, 128  }
 0x182   : > { %2268 = vsyncadd (%p2772_p7), %s565_s22, 4294967168  ;;  %s3314_s25 = sld [smem:[#allocation37_spill]] }
 0x188   : > { %p3315_p6 = scmp.eq.s32.totalorder %s3314_s25, 0 }
 0x18a   : > { %2270 = dma.done.wait (%p3315_p6), [#allocation6], 512   ;;  %p3316_p10 = pmov %p3315_p6 }
 0x18b   : > { %p3317_p11 = pmov %p3315_p6 }
 0x18c   : > { %2272 = vsyncadd (%p3316_p10), [#allocation6], 4294966784 }
 0x18d   : > { %2274 = dma.done.wait (%p3317_p11), [#allocation9], 512   ;;  %p3318_p8 = pmov %p3315_p6 }
 0x18e   : > { %p3319_p5 = pmov %p3315_p6 }
 0x18f   : > { %2276 = vsyncadd (%p3318_p8), [#allocation9], 4294966784 }
 0x190   : > { %2278 = dma.done.wait (%p3319_p5), [#allocation12], 512   ;;  %p3320_p9 = pmov %p3319_p5 }
 0x191   : > { %p3321_p7 = pmov %p3319_p5 }
 0x192   : > { %2280 = vsyncadd (%p3320_p9), [#allocation12], 4294966784 }
 0x193   : > { %2282 = dma.done.wait (%p3321_p7), [#allocation15], 272   ;;  %p3322_p4 = pmov %p3319_p5 }
 0x195   : > { %2284 = vsyncadd (%p3322_p4), [#allocation15], 4294967024  ;;  %p3323_p12 = pmov %p3322_p4 }
 0x196   : > { %p3324_p1 = pmov %p3322_p4 }
 0x197   : > { %2286 = dma.done.wait (%p3323_p12), [#allocation18], 512  }
 0x198   : > { %2288 = vsyncadd (%p3324_p1), [#allocation18], 4294966784  ;;  %p3325_p13 = pmov %p3324_p1 }
 0x199   : > { %p3326_p0 = pmov %p3324_p1 }
 0x19a   : > { %2290 = dma.done.wait (%p3325_p13), [#allocation21], 128  }
 0x19b   : > { %2292 = vsyncadd (%p3326_p0), [#allocation21], 4294967168  ;;  %p3327_p2 = pmov %p3326_p0 }
 0x19c   : > { %p3328_p3 = pmov %p3326_p0 }
 0x19d   : > { %2294 = dma.done.wait (%p3327_p2), [#allocation24], 64  }
 0x19e   : > { %2296 = vsyncadd (%p3328_p3), [#allocation24], 4294967232  ;;  %v2333_v0 = vmov 0.0   ;;  %v2334_v1 = vmov 0   ;;  %v2866_v2 = vld [vmem:[%s568_s30] sm:$0xff]  ;;  %vm848_vm0 = vcmask 1043456  }
 0x19f   : > { %917 = vmatprep.mubr.f32.mxu0 %v2333_v0  ;;  %1801 = vset.pattern.permute.xlu1 %v2334_v1  ;;  %v2870_v3 = vcombine.high %v2866_v2, %v2866_v2  ;;  %v669_v4 = vld [vmem:[#allocation8] sm:$0xff]  ;;  %vm3286_vm1 = vcmask 31744   ;;  %v667_v6 = vld [vmem:[#allocation7] sm:$0xff]  ;;  %v670_v7 = vld [vmem:[#allocation8 + $0x8] sm:$0xff]  ;;  %v2335_v12 = vmov 1   ;;  %v2336_v13 = vmov 2  }
 0x1a0   : > { %1800 = vset.pattern.permute.xlu0 %v2334_v1  ;;  %1312 = vmatprep.mubr.f32.mxu1 %v2333_v0  ;;  %v665_v5 = vld [vmem:[#allocation5] sm:$0xff]  ;;  %v668_v8 = vld [vmem:[#allocation7 + $0x8] sm:$0xff]  ;;  %v666_v9 = vld [vmem:[#allocation5 + $0x8] sm:$0xff]  ;;  %v2337_v14 = vmov 4   ;;  %v2338_v15 = vmov 3   ;;  %v2339_v16 = vmov 5  }
 0x1a1   : > { %946 = vperm.xlu1 %1801, %v669_v4   ;;  %1585 = vmatprep.subr.msk.mxu0 %vm848_vm0, %v2870_v3  ;;  %v686_v10 = vld [vmem:[#allocation10 + $0x8] sm:$0xff]  ;;  %v685_v11 = vld [vmem:[#allocation10] sm:$0xff]  ;;  %v2340_v17 = vmov 6   ;;  %v2341_v18 = vmov 7   ;;  %v671_v19 = vld [vmem:[#allocation11] sm:$0xff]  ;;  %v2342_v20 = vmov 8  }
 0x1a2   : > { %932 = vperm.xlu0 %1800, %v667_v6   ;;  %1586 = vmatpush1.msk.msra.mxu0 %vm848_vm0, %v2866_v2  ;;  %v672_v21 = vld [vmem:[#allocation11 + $0x8] sm:$0xff]  ;;  %s2343_s24 = smov 15   ;;  %s2344_s26 = smov 17   ;;  %v674_v59 = vld [vmem:[#allocation13 + $0x8] sm:$0xff]  ;;  %v673_v60 = vld [vmem:[#allocation13] sm:$0xff] }
 0x1a3   : > { %1587 = vmatmul.mubr.msk.f32.vlgmr.msra.gmra.mrb[0].mxu0 %vm3286_vm1, %v665_v5  ;;  %s2345_s20 = smov 1   ;;  %s2346_s17 = smov 16  }
 0x1a4   : > { %923 = vmatprep.mubr.f32.mxu0 %v2333_v0  ;;  %s2347_s29 = smov 111   ;;  %s2348_s19 = smov 127  }
 0x1a5   : > { %951 = vperm.xlu1 %1801, %v670_v7   ;;  %s2349_s1 = smov 113   ;;  %s2350_s22 = smov 112  }
 0x1a6   : > { %937 = vperm.xlu0 %1800, %v668_v8   ;;  %s1598_s30 = sshll.u32 %s3314_s25, 7  ;;  %p3351_p10 = scmp.ne.s32.totalorder %s3307_s14, 0 }
 0x1a7   : > { %1588 = vmatmul.mubr.msk.f32.gmra.mrb[2].mxu0 %vm3286_vm1, %v666_v9 }
 0x1a9   : > { %709 = vperm.xlu1 %1801, %v686_v10  }
 0x1aa   : > { %1802 = vset.pattern.permute.xlu0 %v2335_v12 }
 0x1ab   : > { %721 = vperm.xlu0 %1802, %v685_v11  }
 0x1ad   : > { %1803 = vset.pattern.permute.xlu1 %v2335_v12 }
 0x1ae   : > { %725 = vperm.xlu1 %1803, %v686_v10  }
 0x1af   : > { %1805 = vset.pattern.permute.xlu0 %v2336_v13 }
 0x1b0   : > { %745 = vperm.xlu0 %1805, %v686_v10  }
 0x1b2   : > { %1804 = vset.pattern.permute.xlu1 %v2336_v13 }
 0x1b3   : > { %741 = vperm.xlu1 %1804, %v685_v11  }
 0x1b4   : > { %1807 = vset.pattern.permute.xlu0 %v2337_v14 }
 0x1b5   : > { %1047 = vperm.xlu0 %1807, %v685_v11  }
 0x1b7   : > { %1806 = vset.pattern.permute.xlu1 %v2338_v15 }
 0x1b8   : > { %757 = vperm.xlu1 %1806, %v685_v11  }
 0x1b9   : > { %1810 = vset.pattern.permute.xlu0 %v2339_v16 }
 0x1ba   : > { %777 = vperm.xlu0 %1810, %v686_v10  }
 0x1bc   : > { %761 = vperm.xlu1 %1806, %v686_v10  }
 0x1be   : > { %1811 = vset.pattern.permute.xlu0 %v2340_v17 }
 0x1bf   : > { %793 = vperm.xlu0 %1811, %v685_v11  }
 0x1c0   : > { %1808 = vset.pattern.permute.xlu1 %v2337_v14  ;;  %v687_v14 = vlaneseq }
 0x1c1   : > { %1051 = vperm.xlu1 %1808, %v686_v10  }
 0x1c3   : > { %1814 = vset.pattern.permute.xlu0 %v2341_v18 }
 0x1c4   : > { %813 = vperm.xlu0 %1814, %v686_v10  }
 0x1c5   : > { %1809 = vset.pattern.permute.xlu1 %v2339_v16 }
 0x1c6   : > { %773 = vperm.xlu1 %1809, %v685_v11  }
 0x1c8   : > { %1815 = vset.pattern.permute.xlu0 %v2334_v1 }
 0x1c9   : > { %704 = vperm.xlu0 %1815, %v685_v11  }
 0x1ca   : > { %1812 = vset.pattern.permute.xlu1 %v2340_v17  ;;  %v2931_v17 = vand.u32 127, %v687_v14 }
 0x1cb   : > { %797 = vperm.xlu1 %1812, %v686_v10  }
 0x1cc   : > { %vm974_vm3 = vcmp.lt.s32.totalorder %v2931_v17, 17  ;;  %vm991_vm4 = vcmp.lt.s32.totalorder %v2931_v17, 16  ;;  %vm692_vm5 = vcmp.ge.s32.totalorder %v2931_v17, 16  ;;  %vm1033_vm11 = vcmp.lt.s32.totalorder %v2931_v17, 1 }
 0x1cd   : > { %1148 = vperm.xlu0 %1815, %v671_v19   ;;  %vm1012_vm12 = vcmp.lt.s32.totalorder %v2931_v17, 15  ;;  %vm1070_vm13 = vcmp.lt.s32.totalorder %v2931_v17, 127  ;;  %vm1091_vm15 = vcmp.lt.s32.totalorder %v2931_v17, 113  ;;  %vm1112_vm1 = vcmp.lt.s32.totalorder %v2931_v17, 112 }
 0x1cf   : > { %1813 = vset.pattern.permute.xlu1 %v2341_v18 }
 0x1d0   : > { %809 = vperm.xlu1 %1813, %v685_v11  }
 0x1d4   : > { %1816 = vset.pattern.permute.xlu1 %v2342_v20  ;;  %v2936_v20 = vadd.s32 128, %v2931_v17 }
 0x1d5   : > { %827 = vperm.xlu1 %1816, %v685_v11  }
 0x1d6   : > { %vm785_vm14 = vcmp.lt.s32.totalorder %v2936_v20, 240 }
 0x1d9   : > { %831 = vperm.xlu1 %1816, %v686_v10  }
 0x1dd   : > { %1817 = vset.pattern.permute.xlu1 %v2334_v1 }
 0x1de   : > { %1153 = vperm.xlu1 %1817, %v672_v21  }
 0x220   : > { %v947_v22 = vpop.permute.xlu1 %946 }
 0x221   : > { %v933_v25 = vpop.permute.xlu0 %932 }
 0x224   : > { %v952_v23 = vpop.permute.xlu1 %951 }
 0x225   : > { %v938_v27 = vpop.permute.xlu0 %937 }
 0x228   : > { %v2878_v24 = vpop.permute.xlu1 %709 }
 0x22a   : > { %v2884_v29 = vpop.permute.xlu0 %721 }
 0x22d   : > { %v2880_v26 = vpop.permute.xlu1 %725 }
 0x22f   : > { %v2888_v32 = vpop.permute.xlu0 %745 }
 0x232   : > { %v2882_v28 = vpop.permute.xlu1 %741 }
 0x234   : > { %v1048_v45 = vpop.permute.xlu0 %1047 }
 0x237   : > { %v2886_v30 = vpop.permute.xlu1 %757 }
 0x239   : > { %v2912_v63 = vpop.permute.xlu0 %777 }
 0x23b   : > { %v2890_v39 = vpop.permute.xlu1 %761 }
 0x23e   : > { %v2916_v1 = vpop.permute.xlu0 %793 }
 0x240   : > { %v1052_v54 = vpop.permute.xlu1 %1051 }
 0x243   : > { %v2920_v5 = vpop.permute.xlu0 %813 }
 0x245   : > { %v2908_v61 = vpop.permute.xlu1 %773 }
 0x248   : > { %v705_v7 = vpop.permute.xlu0 %704 }
 0x24a   : > { %v2910_v62 = vpop.permute.xlu1 %797 }
 0x24c   : > { %v2926_v9 = vpop.permute.xlu0 %1148 }
 0x24f   : > { %v2914_v0 = vpop.permute.xlu1 %809 }
 0x254   : > { %v2918_v4 = vpop.permute.xlu1 %827 }
 0x258   : > { %v2922_v6 = vpop.permute.xlu1 %831 }
 0x25d   : > { %v2924_v8 = vpop.permute.xlu1 %1153 }
 0x276   : > { %v919_v31 = vpop.f32.mrb[0].mxu0 }
 0x277   : > { %v940_v33 = vmul.f32 %v933_v25, %v919_v31  ;;  %v921_v34 = vpop.f32.mrb[1].mxu0 }
 0x278   : > { %v941_v35 = vmul.f32 %v933_v25, %v921_v34  ;;  %v691_v25 = vand.u32 15, %v2936_v20  ;;  %v819_v34 = vsel %vm785_vm14, %v2920_v5, 0.0 }
 0x279   : > { %v954_v36 = vadd.f32 %v947_v22, %v940_v33 }
 0x27a   : > { %v955_v37 = vadd.f32 %v947_v22, %v941_v35  ;;  %v925_v38 = vpop.f32.mrb[2].mxu0  ;;  %vm2957_vm7 = vcmp.ge.s32.totalorder %v691_v25, 1  ;;  %vm2961_vm8 = vcmp.lt.s32.totalorder %v691_v25, 15 }
 0x27b   : > { %v958_v40 = vmax.f32 %v954_v36, 0.0  ;;  %v942_v41 = vmul.f32 %v938_v27, %v925_v38  ;;  %v927_v42 = vpop.f32.mrb[3].mxu0  ;;  %v728_v38 = vsel %vm692_vm5, %v2884_v29, 0.0  ;;  %vm3042_vm0 = vmand %vm785_vm14, %vm2957_vm7 }
 0x27c   : > { %v959_v43 = vmax.f32 %v955_v37, 0.0  ;;  %v943_v44 = vmul.f32 %v938_v27, %v927_v42  ;;  %v803_v36 = vsel %vm3042_vm0, %v2910_v62, 0.0 }
 0x27d   : > { %v962_v46 = vmin.f32 %v958_v40, 6.0  ;;  %v956_v47 = vadd.f32 %v952_v23, %v942_v41 }
 0x27e   : > { %v963_v48 = vmin.f32 %v959_v43, 6.0  ;;  %v957_v49 = vadd.f32 %v952_v23, %v943_v44  ;;  %v690_v23 = vand.u32 15, %v2931_v17 }
 0x27f   : > { %v960_v50 = vmax.f32 %v956_v47, 0.0  ;;  %v2892_v51 = vmul.f32 %v1048_v45, %v962_v46  ;;  %1004 = vrot.lane.b32.xlu1 %v962_v46, %s2343_s24  ;;  %966 = vrot.lane.b32.xlu0 %v962_v46, %s2344_s26 }
 0x280   : > { %v961_v52 = vmax.f32 %v957_v49, 0.0  ;;  %v2896_v53 = vmul.f32 %v1048_v45, %v963_v48  ;;  %vm2946_vm2 = vcmp.lt.s32.totalorder %v690_v23, 15  ;;  %vm2953_vm6 = vcmp.ge.s32.totalorder %v690_v23, 1 }
 0x281   : > { %v964_v55 = vmin.f32 %v960_v50, 6.0  ;;  %vm2969_vm9 = vmand %vm692_vm5, %vm2946_vm2 }
 0x282   : > { %v965_v56 = vmin.f32 %v961_v52, 6.0  ;;  %vm2990_vm10 = vmand %vm692_vm5, %vm2953_vm6  ;;  %v748_v49 = vsel %vm2969_vm9, %v2882_v28, 0.0  ;;  %v713_v52 = vsel %vm2957_vm7, %v705_v7, 0.0 }
 0x283   : > { %v2898_v57 = vmul.f32 %v1052_v54, %v964_v55  ;;  %1025 = vrot.lane.b32.xlu1 %v962_v46, %s2345_s20  ;;  %983 = vrot.lane.b32.xlu0 %v962_v46, %s2346_s17  ;;  %v712_v50 = vsel %vm2990_vm10, %v705_v7, 0.0 }
 0x284   : > { %v2900_v58 = vmul.f32 %v1052_v54, %v965_v56  ;;  %v749_v54 = vsel %vm2961_vm8, %v2882_v28, 0.0 }
 0x287   : > { %1125 = vrot.lane.b32.xlu1 %v962_v46, %s2347_s29  ;;  %1062 = vrot.lane.b32.xlu0 %v962_v46, %s2348_s19 }
 0x28b   : > { %1083 = vrot.lane.b32.xlu0 %v962_v46, %s2349_s1  ;;  %1029 = vrot.lane.b32.xlu1 %v963_v48, %s2345_s20 }
 0x28f   : > { %1104 = vrot.lane.b32.xlu0 %v962_v46, %s2350_s22  ;;  %968 = vrot.lane.b32.xlu1 %v964_v55, %s2344_s26 }
 0x293   : > { %970 = vrot.lane.b32.xlu0 %v963_v48, %s2344_s26  ;;  %985 = vrot.lane.b32.xlu1 %v964_v55, %s2346_s17 }
 0x297   : > { %987 = vrot.lane.b32.xlu0 %v963_v48, %s2346_s17  ;;  %1006 = vrot.lane.b32.xlu1 %v964_v55, %s2343_s24 }
 0x29b   : > { %1008 = vrot.lane.b32.xlu0 %v963_v48, %s2343_s24  ;;  %1064 = vrot.lane.b32.xlu1 %v964_v55, %s2348_s19 }
 0x29f   : > { %1066 = vrot.lane.b32.xlu0 %v963_v48, %s2348_s19  ;;  %1085 = vrot.lane.b32.xlu1 %v964_v55, %s2349_s1 }
 0x2a3   : > { %1087 = vrot.lane.b32.xlu0 %v963_v48, %s2349_s1  ;;  %1106 = vrot.lane.b32.xlu1 %v964_v55, %s2350_s22 }
 0x2a7   : > { %1108 = vrot.lane.b32.xlu0 %v963_v48, %s2350_s22  ;;  %972 = vrot.lane.b32.xlu1 %v965_v56, %s2344_s26 }
 0x2ab   : > { %1027 = vrot.lane.b32.xlu0 %v964_v55, %s2345_s20  ;;  %989 = vrot.lane.b32.xlu1 %v965_v56, %s2346_s17 }
 0x2af   : > { %1031 = vrot.lane.b32.xlu0 %v965_v56, %s2345_s20  ;;  %1010 = vrot.lane.b32.xlu1 %v965_v56, %s2343_s24  ;;  %s664_s24 = scalar_lea.vmem [#allocation25], %s1570_s0  ;;  %s2351_s0 = smov [#allocation25]  }
 0x2b0   : > { %s1356_s26 = sshll.u32 %s664_s24, 4  ;;  %s2225_s25 = sshll.u32 %s2351_s0, 4  ;;  %s3219_s26 = int_to_ptr.vmem [resolvable:$true] %s1356_s26  ;;  %s2226_s25 = int_to_ptr.vmem [resolvable:$false] %s2225_s25 }
 0x2b1   : > { %s2221_s2 = scalar_lea.vmem %s3219_s26, 128  ;;  %s2227_s3 = scalar_lea.vmem %s2226_s25, 256 }
 0x2b2   : > { %p2222_p6 = scmp.ne.s32.totalorder %s3219_s26, %s2221_s2  ;;  %p2228_p5 = scmp.lt.s32.totalorder %s3219_s26, %s2226_s25 }
 0x2b3   : > { %1127 = vrot.lane.b32.xlu0 %v964_v55, %s2347_s29  ;;  %1129 = vrot.lane.b32.xlu1 %v963_v48, %s2347_s29  ;;  %p2229_p9 = scmp.lt.s32.totalorder %s2227_s3, %s2221_s2 }
 0x2b4   : > { %p2223_p11 = pnand %p2222_p6, %p3351_p10 }
 0x2b5   : > { %p2230_p7 = por %p2229_p9, %p2228_p5 }
 0x2b6   : > { %p2224_p8 = pneg %p2223_p11 }
 0x2b7   : > { %1131 = vrot.lane.b32.xlu0 %v965_v56, %s2347_s29  ;;  %1068 = vrot.lane.b32.xlu1 %v965_v56, %s2348_s19  ;;  %s3349_s29 = sld [smem:[#allocation43_spill]] }
 0x2b8   : > { %p2231_p4 = pnand %p2230_p7, %p2224_p8 }
 0x2bb   : > { %1167 = vperm.xlu0 %1815, %v674_v59   ;;  %1089 = vrot.lane.b32.xlu1 %v965_v56, %s2349_s1 }
 0x2bd   : > { %s3350_s19 = smov %s3349_s29  ;;  %s3217_s1 = scalar_lea.hbm %s3349_s29, %s1598_s30 }
 0x2bf   : > { %1110 = vrot.lane.b32.xlu1 %v965_v56, %s2350_s22  ;;  %s1342_s22 = scalar_lea.sflag [#allocation4], %s2826_s21 }
 0x2c3   : > { %1162 = vperm.xlu1 %1817, %v673_v60  }
 0x2f1   : > { %v1005_v10 = vpop.permute.xlu1 %1004  ;;  %v967_v11 = vpop.permute.xlu0 %966 }
 0x2f5   : > { %v1026_v12 = vpop.permute.xlu1 %1025  ;;  %v984_v13 = vpop.permute.xlu0 %983 }
 0x2f9   : > { %v2928_v15 = vpop.permute.xlu1 %1125  ;;  %v1063_v16 = vpop.permute.xlu0 %1062 }
 0x2fd   : > { %v2933_v18 = vpop.permute.xlu0 %1083  ;;  %v1030_v19 = vpop.permute.xlu1 %1029 }
 0x2fe   : > { %v1034_v60 = vsel %vm1033_vm11, %v1026_v12, %v1030_v19 }
 0x301   : > { %v2938_v21 = vpop.permute.xlu0 %1104  ;;  %v2940_v22 = vpop.permute.xlu1 %968 }
 0x305   : > { %v971_v27 = vpop.permute.xlu0 %970  ;;  %v2944_v31 = vpop.permute.xlu1 %985 }
 0x306   : > { %v975_v42 = vsel %vm974_vm3, %v967_v11, %v971_v27  ;;  %v977_v43 = vsel %vm974_vm3, %v971_v27, %v967_v11  ;;  %v1036_v11 = vsel %vm1033_vm11, %v1030_v19, %v1026_v12 }
 0x307   : > { %v979_v55 = vmul.f32 %v977_v43, %v712_v50  ;;  %v980_v56 = vmul.f32 %v975_v42, %v713_v52  ;;  %v781_v50 = vsel %vm2961_vm8, %v2908_v61, 0.0 }
 0x309   : > { %v988_v40 = vpop.permute.xlu0 %987  ;;  %v2976_v41 = vpop.permute.xlu1 %1006 }
 0x30a   : > { %v992_v44 = vsel %vm991_vm4, %v984_v13, %v988_v40  ;;  %v994_v45 = vsel %vm991_vm4, %v988_v40, %v984_v13  ;;  %v765_v40 = vsel %vm2957_vm7, %v2886_v30, 0.0 }
 0x30b   : > { %v996_v47 = vmul.f32 %v994_v45, %v728_v38  ;;  %v997_v48 = vmul.f32 %v992_v44, %v2884_v29  ;;  %v764_v38 = vsel %vm2953_vm6, %v2886_v30, 0.0  ;;  %v1039_v12 = vmul.f32 %v1034_v60, %v765_v40 }
 0x30c   : > { %v1038_v42 = vmul.f32 %v1036_v11, %v764_v38  ;;  %v780_v30 = vsel %vm2946_vm2, %v2908_v61, 0.0  ;;  %v800_v61 = vsel %vm2953_vm6, %v2916_v1, 0.0  ;;  %v801_v11 = vsel %vm3042_vm0, %v2916_v1, 0.0 }
 0x30d   : > { %v1009_v59 = vpop.permute.xlu0 %1008  ;;  %v3007_v29 = vpop.permute.xlu1 %1064  ;;  %v1000_v28 = vadd.f32 %v996_v47, %v979_v55  ;;  %v1001_v23 = vadd.f32 %v997_v48, %v980_v56  ;;  %v730_v1 = vsel %vm692_vm5, %v2880_v26, 0.0 }
 0x30e   : > { %v1013_v7 = vsel %vm1012_vm12, %v1005_v10, %v1009_v59  ;;  %v1015_v13 = vsel %vm1012_vm12, %v1009_v59, %v1005_v10 }
 0x30f   : > { %v1017_v25 = vmul.f32 %v1015_v13, %v748_v49  ;;  %v1018_v27 = vmul.f32 %v1013_v7, %v749_v54 }
 0x311   : > { %v1021_v19 = vadd.f32 %v1017_v25, %v1000_v28  ;;  %v1022_v43 = vadd.f32 %v1018_v27, %v1001_v23  ;;  %v1067_v44 = vpop.permute.xlu0 %1066  ;;  %v3024_v45 = vpop.permute.xlu1 %1085 }
 0x312   : > { %v1071_v10 = vsel %vm1070_vm13, %v1063_v16, %v1067_v44  ;;  %v1073_v47 = vsel %vm1070_vm13, %v1067_v44, %v1063_v16 }
 0x313   : > { %v1042_v48 = vadd.f32 %v1038_v42, %v1021_v19  ;;  %v1043_v49 = vadd.f32 %v1039_v12, %v1022_v43  ;;  %v1075_v55 = vmul.f32 %v1071_v10, %v780_v30  ;;  %v1076_v56 = vmul.f32 %v1073_v47, %v781_v50 }
 0x314   : > { %v751_v50 = vsel %vm2961_vm8, %v2888_v32, 0.0 }
 0x315   : > { %v1058_v16 = vadd.f32 %v2892_v51, %v1042_v48  ;;  %v1059_v54 = vadd.f32 %v2896_v53, %v1043_v49  ;;  %v1088_v59 = vpop.permute.xlu0 %1087  ;;  %v3048_v60 = vpop.permute.xlu1 %1106  ;;  %v715_v48 = vsel %vm2957_vm7, %v2878_v24, 0.0 }
 0x316   : > { %v1092_v7 = vsel %vm1091_vm15, %v2933_v18, %v1088_v59  ;;  %v1094_v51 = vsel %vm1091_vm15, %v1088_v59, %v2933_v18 }
 0x317   : > { %v1079_v53 = vadd.f32 %v1075_v55, %v1058_v16  ;;  %v1080_v13 = vadd.f32 %v1076_v56, %v1059_v54  ;;  %v1096_v28 = vmul.f32 %v1092_v7, %v800_v61  ;;  %v1097_v23 = vmul.f32 %v1094_v51, %v801_v11 }
 0x319   : > { %v1100_v25 = vadd.f32 %v1096_v28, %v1079_v53  ;;  %v1101_v27 = vadd.f32 %v1097_v23, %v1080_v13  ;;  %v1109_v38 = vpop.permute.xlu0 %1108  ;;  %v973_v40 = vpop.permute.xlu1 %972  ;;  %v766_v53 = vsel %vm2953_vm6, %v2890_v39, 0.0  ;;  %v767_v13 = vsel %vm2957_vm7, %v2890_v39, 0.0 }
 0x31a   : > { %v1113_v42 = vsel %vm1112_vm1, %v2938_v21, %v1109_v38  ;;  %v1115_v18 = vsel %vm1112_vm1, %v1109_v38, %v2938_v21  ;;  %v976_v43 = vsel %vm974_vm3, %v2940_v22, %v973_v40  ;;  %v978_v44 = vsel %vm974_vm3, %v973_v40, %v2940_v22 }
 0x31b   : > { %v714_v21 = vsel %vm2990_vm10, %v2878_v24, 0.0  ;;  %v750_v22 = vsel %vm2969_vm9, %v2888_v32, 0.0  ;;  %vm1133_vm3 = vcmp.lt.s32.totalorder %v2931_v17, 111  ;;  %v982_v16 = vmul.f32 %v976_v43, %v715_v48 }
 0x31c   : > { %v981_v46 = vmul.f32 %v978_v44, %v714_v21  ;;  %v834_v28 = vsel %vm2946_vm2, %v2918_v4, 0.0  ;;  %vm1244_vm7 = vcmask 130048  }
 0x31d   : > { %v1028_v12 = vpop.permute.xlu0 %1027  ;;  %v990_v19 = vpop.permute.xlu1 %989 }
 0x31e   : > { %v993_v10 = vsel %vm991_vm4, %v2944_v31, %v990_v19  ;;  %v995_v47 = vsel %vm991_vm4, %v990_v19, %v2944_v31  ;;  %v817_v31 = vsel %vm785_vm14, %v2914_v0, 0.0  ;;  %vm3105_vm4 = vmand %vm785_vm14, %vm2961_vm8 }
 0x31f   : > { %v998_v49 = vmul.f32 %v995_v47, %v730_v1  ;;  %v999_v30 = vmul.f32 %v993_v10, %v2880_v26  ;;  %v1117_v26 = vmul.f32 %v1113_v42, %v2914_v0  ;;  %v1118_v37 = vmul.f32 %v1115_v18, %v817_v31 }
 0x321   : > { %v1032_v32 = vpop.permute.xlu0 %1031  ;;  %v1011_v54 = vpop.permute.xlu1 %1010  ;;  %v1002_v0 = vadd.f32 %v998_v49, %v981_v46  ;;  %v1003_v11 = vadd.f32 %v999_v30, %v982_v16  ;;  %v1121_v18 = vadd.f32 %v1117_v26, %v1100_v25 }
 0x322   : > { %v1035_v55 = vsel %vm1033_vm11, %v1028_v12, %v1032_v32  ;;  %v1037_v56 = vsel %vm1033_vm11, %v1032_v32, %v1028_v12  ;;  %v1014_v59 = vsel %vm1012_vm12, %v2976_v41, %v1011_v54  ;;  %v1016_v61 = vsel %vm1012_vm12, %v1011_v54, %v2976_v41 }
 0x323   : > { %v1019_v7 = vmul.f32 %v1016_v61, %v750_v22  ;;  %v1020_v51 = vmul.f32 %v1014_v59, %v751_v50  ;;  %v835_v41 = vsel %vm3105_vm4, %v2918_v4, 0.0  ;;  %v1040_v23 = vmul.f32 %v1037_v56, %v766_v53 }
 0x324   : > { %v1041_v38 = vmul.f32 %v1035_v55, %v767_v13  ;;  %v1122_v12 = vadd.f32 %v1118_v37, %v1101_v27  ;;  %v782_v27 = vsel %vm2946_vm2, %v2912_v63, 0.0 }
 0x325   : > { %v1023_v40 = vadd.f32 %v1019_v7, %v1002_v0  ;;  %v1024_v1 = vadd.f32 %v1020_v51, %v1003_v11  ;;  %v1130_v42 = vpop.permute.xlu1 %1129  ;;  %v1128_v4 = vpop.permute.xlu0 %1127  ;;  %v836_v11 = vsel %vm2946_vm2, %v2922_v6, 0.0  ;;  %v837_v7 = vsel %vm3105_vm4, %v2922_v6, 0.0 }
 0x326   : > { %v1134_v35 = vsel %vm1133_vm3, %v2928_v15, %v1130_v42  ;;  %v1136_v39 = vsel %vm1133_vm3, %v1130_v42, %v2928_v15  ;;  %v783_v15 = vsel %vm2961_vm8, %v2912_v63, 0.0  ;;  %v802_v63 = vsel %vm2953_vm6, %v2910_v62, 0.0 }
 0x327   : > { %v1044_v19 = vadd.f32 %v1040_v23, %v1023_v40  ;;  %v1045_v43 = vadd.f32 %v1041_v38, %v1024_v1  ;;  %v1138_v44 = vmul.f32 %v1134_v35, %v834_v28  ;;  %v1139_v10 = vmul.f32 %v1136_v39, %v835_v41 }
 0x329   : > { %v1142_v47 = vadd.f32 %v1138_v44, %v1121_v18  ;;  %v1143_v21 = vadd.f32 %v1139_v10, %v1122_v12  ;;  %v1060_v48 = vadd.f32 %v2898_v57, %v1044_v19  ;;  %v1069_v49 = vpop.permute.xlu1 %1068  ;;  %v1061_v25 = vadd.f32 %v2900_v58, %v1045_v43 }
 0x32a   : > { %v1072_v30 = vsel %vm1070_vm13, %v3007_v29, %v1069_v49  ;;  %v1074_v22 = vsel %vm1070_vm13, %v1069_v49, %v3007_v29 }
 0x32b   : > { %v1077_v57 = vmul.f32 %v1072_v30, %v782_v27  ;;  %v1078_v50 = vmul.f32 %v1074_v22, %v783_v15  ;;  %v1156_v58 = vmul.f32 %v2926_v9, %v1142_v47  ;;  %v1157_v31 = vmul.f32 %v2926_v9, %v1143_v21  ;;  %v1132_v9 = vpop.permute.xlu0 %1131  ;;  %v676_v47 = vld [vmem:[#allocation14 + $0x8] sm:$0xff]  ;;  %v675_v21 = vld [vmem:[#allocation14] sm:$0xff] }
 0x32c   : > { %v1135_v62 = vsel %vm1133_vm3, %v1128_v4, %v1132_v9  ;;  %v1137_v52 = vsel %vm1133_vm3, %v1132_v9, %v1128_v4 }
 0x32d   : > { %v1081_v26 = vadd.f32 %v1077_v57, %v1060_v48  ;;  %v1082_v37 = vadd.f32 %v1078_v50, %v1061_v25  ;;  %v1090_v46 = vpop.permute.xlu1 %1089  ;;  %v1140_v51 = vmul.f32 %v1135_v62, %v836_v11  ;;  %v1141_v53 = vmul.f32 %v1137_v52, %v837_v7  ;;  %v681_v52 = vld [vmem:[#allocation19 + $0x8] sm:$0xff] }
 0x32e   : > { %v1093_v29 = vsel %vm1091_vm15, %v3024_v45, %v1090_v46  ;;  %v1095_v16 = vsel %vm1091_vm15, %v1090_v46, %v3024_v45 }
 0x32f   : > { %v1098_v32 = vmul.f32 %v1093_v29, %v802_v63  ;;  %v1099_v54 = vmul.f32 %v1095_v16, %v803_v36  ;;  %v1205_v63 = vshrl.u32 %v687_v14, 7 }
 0x331   : > { %v1102_v55 = vadd.f32 %v1098_v32, %v1081_v26  ;;  %v1103_v56 = vadd.f32 %v1099_v54, %v1082_v37  ;;  %v1111_v59 = vpop.permute.xlu1 %1110  ;;  %v677_v37 = vld [vmem:[#allocation16] sm:$0x1]  ;;  %v1206_v16 = vsub.s32 0, %v1205_v63  ;;  %v679_v32 = vld [vmem:[#allocation17 + $0x8] sm:$0xff]  ;;  %v678_v54 = vld [vmem:[#allocation17] sm:$0xff] }
 0x332   : > { %v1114_v45 = vsel %vm1112_vm1, %v3048_v60, %v1111_v59  ;;  %v1116_v61 = vsel %vm1112_vm1, %v1111_v59, %v3048_v60  ;;  %vm3345_vm1 = vcmask 31744  }
 0x333   : > { %v1119_v20 = vmul.f32 %v1114_v45, %v2920_v5  ;;  %v1120_v0 = vmul.f32 %v1116_v61, %v819_v34  ;;  %vm3346_vm2 = vmmov %vm3345_vm1  ;;  %v680_v45 = vld [vmem:[#allocation19] sm:$0xff] }
 0x334   : > { %vm3347_vm5 = vmmov %vm3345_vm1 }
 0x335   : > { %v1123_v13 = vadd.f32 %v1119_v20, %v1102_v55  ;;  %v1124_v28 = vadd.f32 %v1120_v0, %v1103_v56  ;;  %vm3348_vm6 = vmmov %vm3345_vm1 }
 0x337   : > { %v1144_v41 = vadd.f32 %v1140_v51, %v1123_v13  ;;  %v1145_v23 = vadd.f32 %v1141_v53, %v1124_v28 }
 0x339   : > { %v1158_v17 = vmul.f32 %v2924_v8, %v1144_v41  ;;  %v1159_v60 = vmul.f32 %v2924_v8, %v1145_v23 }
 0x33a   : > { %v1168_v5 = vpop.permute.xlu0 %1167 }
 0x33b   : > { %v1172_v38 = vadd.f32 %v1168_v5, %v1158_v17  ;;  %v1173_v40 = vadd.f32 %v1168_v5, %v1159_v60  ;;  %v683_v17 = vld [vmem:[#allocation22] sm:$0xf]  ;;  %v684_v60 = vld [vmem:[#allocation23] sm:$0xf] }
 0x33d   : > { %v1176_v1 = vmax.f32 %v1172_v38, 0.0  ;;  %v1177_v33 = vmax.f32 %v1173_v40, 0.0 }
 0x33f   : > { %v3188_v42 = vmin.f32 %v1176_v1, 6.0  ;;  %v3190_v18 = vmin.f32 %v1177_v33, 6.0 }
 0x341   : > { %v1185_v6 = vadd.f32 %v3190_v18, %v3188_v42 }
 0x342   : > { %v1163_v24 = vpop.permute.xlu1 %1162 }
 0x343   : > { %v1170_v12 = vadd.f32 %v1163_v24, %v1156_v58  ;;  %v1171_v35 = vadd.f32 %v1163_v24, %v1157_v31  ;;  %1186 = vadd.xlane.f32.xlu0 %v1185_v6 }
 0x345   : > { %v1174_v39 = vmax.f32 %v1170_v12, 0.0  ;;  %v1175_v19 = vmax.f32 %v1171_v35, 0.0  ;;  %v682_v35 = vld [vmem:[#allocation20] sm:$0xf] }
 0x347   : > { %v3194_v43 = vmin.f32 %v1174_v39, 6.0  ;;  %v3196_v8 = vmin.f32 %v1175_v19, 6.0 }
 0x349   : > { %v1182_v44 = vadd.f32 %v3196_v8, %v3194_v43 }
 0x34b   : > { %1183 = vadd.xlane.f32.xlu1 %v1182_v44 }
 0x3d0   : > { %v1187_v10 = vpop.xlane.xlu0 %1186 }
 0x3d1   : > { %v1189_v4 = vmul.f32 0.00390625, %v1187_v10 }
 0x3d3   : > { %v1191_v49 = vmul.f32 %v1189_v4, %v676_v47 }
 0x3d5   : > { %v1193_v15 = vsel %vm3345_vm1, %v1191_v49, 0.0 }
 0x3d8   : > { %v1184_v48 = vpop.xlane.xlu1 %1183 }
 0x3d9   : > { %v1188_v25 = vmul.f32 0.00390625, %v1184_v48 }
 0x3db   : > { %v1190_v27 = vmul.f32 %v1188_v25, %v675_v21 }
 0x3dd   : > { %v1192_v30 = vsel %vm3346_vm2, %v1190_v27, 0.0 }
 0x3de   : > { %v1194_v22 = vadd.f32 %v1193_v15, %v1192_v30 }
 0x3e0   : > { %v1195_v57 = vrot.slane %v1194_v22, 4 }
 0x3e2   : > { %v1196_v50 = vadd.f32 %v1195_v57, %v1194_v22 }
 0x3e4   : > { %v1197_v58 = vrot.slane %v1196_v50, 2 }
 0x3e6   : > { %v1198_v31 = vadd.f32 %v1197_v58, %v1196_v50 }
 0x3e8   : > { %v1199_v26 = vrot.slane %v1198_v31, 1 }
 0x3ea   : > { %v1200_v46 = vadd.f32 %v1199_v26, %v1198_v31 }
 0x3ec   : > { %v1201_v36 = vadd.f32 %v1200_v46, %v677_v37 }
 0x3ee   : > { %v1202_v29 = vmax.f32 %v1201_v36, 0.0 }
 0x3f0   : > { %v1203_v9 = vmin.f32 %v1202_v29, 6.0 }
 0x3f2   : > { %v1207_v34 = vrot.slane %v1203_v9, %v1206_v16 }
 0x3f4   : > { %v1209_v55 = vmul.f32 %v1207_v34, %v679_v32  ;;  %v1208_v56 = vmul.f32 %v1207_v34, %v678_v54 }
 0x3f6   : > { %v1213_v59 = vsel %vm3347_vm5, %v1209_v55, 0.0  ;;  %v1210_v62 = vsel %vm3348_vm6, %v1208_v56, 0.0 }
 0x3f7   : > { %1214 = vadd.xlane.f32.xlu1 %v1213_v59  ;;  %1211 = vadd.xlane.f32.xlu0 %v1210_v62 }
 0x484   : > { %v1215_v61 = vpop.xlane.xlu1 %1214  ;;  %v1212_v20 = vpop.xlane.xlu0 %1211 }
 0x485   : > { %v1217_v14 = vadd.f32 %v1215_v61, %v681_v52  ;;  %v1216_v0 = vadd.f32 %v1212_v20, %v680_v45 }
 0x487   : > { %v1590_v11 = vmul.f32 -1.442695, %v1217_v14  ;;  %v1589_v7 = vmul.f32 -1.442695, %v1216_v0 }
 0x489   : > { %1819 = vpow2.f32 %v1590_v11 }
 0x48a   : > { %1821 = vpow2.f32 %v1589_v7 }
 0x493   : > { %v1820_v51 = vpop.eup %1819 }
 0x494   : > { %v1822_v53 = vpop.eup %1821  ;;  %v1225_v13 = vadd.f32 1.0, %v1820_v51 }
 0x495   : > { %v1224_v28 = vadd.f32 1.0, %v1822_v53 }
 0x496   : > { %1823 = vrcp.f32 %v1225_v13 }
 0x497   : > { %1825 = vrcp.f32 %v1224_v28 }
 0x4a0   : > { %v1824_v41 = vpop.eup %1823 }
 0x4a1   : > { %v1826_v23 = vpop.eup %1825  ;;  %1237 = vperm.xlu1 %1817, %v1824_v41  }
 0x4a2   : > { %1232 = vperm.xlu0 %1815, %v1826_v23  }
 0x4a5   : > { %1321 = vperm.xlu1 %1817, %v683_v17  }
 0x4a6   : > { %1328 = vperm.xlu0 %1815, %v684_v60  }
 0x520   : > { %v1238_v5 = vpop.permute.xlu1 %1237 }
 0x521   : > { %v1242_v38 = vmul.f32 %v1238_v5, %v3188_v42  ;;  %v1243_v40 = vmul.f32 %v1238_v5, %v3190_v18  ;;  %v1233_v1 = vpop.permute.xlu0 %1232 }
 0x522   : > { %v1240_v33 = vmul.f32 %v1233_v1, %v3194_v43  ;;  %v1241_v6 = vmul.f32 %v1233_v1, %v3196_v8 }
 0x524   : > { %v1599_v24 = vpack.c.bf16 %v1243_v40, %v1241_v6  ;;  %v1601_v12 = vpack.c.bf16 %v1242_v38, %v1240_v33  ;;  %v1322_v39 = vpop.permute.xlu1 %1321 }
 0x525   : > { %v1329_v18 = vpop.permute.xlu0 %1328 }
 0x526   : > { %1600 = vmatprep.subr.bf16.mxu1 %v1599_v24 }
 0x527   : > { %1602 = vmatpush1.bf16.msra.mxu1 %v1601_v12 }
 0x52a   : > { %1591 = vmatmul.mubr.msk.f32.vlgmr.msra.gmra.mrb[0].mxu1 %vm1244_vm7, %v682_v35 }
 0x5fd   : > { %v1314_v19 = vpop.f32.mrb[0].mxu1 }
 0x5fe   : > { %v1324_v42 = vmul.f32 %v1322_v39, %v1314_v19  ;;  %v1316_v44 = vpop.f32.mrb[1].mxu1 }
 0x5ff   : > { %v1325_v10 = vmul.f32 %v1322_v39, %v1316_v44 }
 0x600   : > { %v1331_v43 = vadd.f32 %v1329_v18, %v1324_v42 }
 0x601   : > { %v1332_v4 = vadd.f32 %v1329_v18, %v1325_v10 }
 0x602   : > { %v1334_v8 = vadd.f32 %v1331_v43, %v2866_v2 }
 0x603   : > { %v1335_v47 = vadd.f32 %v1332_v4, %v2870_v3 }
 0x605   : > { %v1338_v21 = vcombine.low %v1334_v8, %v1335_v47 }
 0x607   : > { %1340 = vst [vmem:[%s664_s24] sm:$0xff] %v1338_v21 }
 0x608   : > { %2234 = shalt.err (!%p2231_p4)
}
 0x609   : > { %s2235_s21 = scalar_lea.hbm %s3217_s1, 128  ;;  %s2239_s20 = scalar_lea.hbm %s3350_s19, 256 }
 0x60a   : > { %p2236_p12 = scmp.ne.s32.totalorder %s3217_s1, %s2235_s21  ;;  %p2240_p0 = scmp.lt.u32.totalorder %s3217_s1, %s3350_s19 }
 0x60b   : > { %p2241_p2 = scmp.lt.u32.totalorder %s2239_s20, %s2235_s21  ;;  %p2243_p6 = scmp.lt.u32.totalorder %s2235_s21, %s3217_s1 }
 0x60c   : > { %p2237_p1 = pnand %p2236_p12, %p3351_p10 }
 0x60d   : > { %p2242_p3 = por %p2241_p2, %p2240_p0 }
 0x60e   : > { %p2238_p13 = pneg %p2237_p1 }
 0x60f   : > { %p2244_p11 = por %p2243_p6, %p2242_p3 }
 0x611   : > { %p2245_p8 = pnand %p2244_p11, %p2238_p13 }
 0x613   : > { %2248 = shalt.err (!%p2245_p8)
}
 0x614   : > { %1657 = dma.vmem_to_hbm [thread:$0]  (%p3351_p10), %s3219_s26, 128, %s3217_s1, %s1342_s22  }
 0x615 PF: > { %s3352_s2 = sld [smem:[#allocation35_spill]]  ;;  %p3353_p5 = scmp.ne.s32.totalorder %s3308_s18, 0 }
 0x616   : > { %p3354_p9 = scmp.ge.s32.totalorder %s2315_s16, 2 }
 0x618   : > { %p1704_p7 = pnand %p3354_p9, %p3353_p5 }
 0x61b   : > { %s1368_s3 = sand.u32 1, %s3352_s2  }
 0x61c   : > { %s1369_s0 = scalar_lea.sflag [#allocation4], %s1368_s3 }
 0x61d   : > { %2298 = dma.done.wait (!%p1704_p7), %s1369_s0, 128  }
 0x61e   : > { %2300 = vsyncadd (!%p1704_p7), %s1369_s0, 4294967168  ;;  %s3355_s29 = sld [smem:[#allocation36_spill]]  ;;  %p34_p4 = scmp.ge.s32.totalorder %s2756_s23, 4  }
 0x61f   : > { %s3356_s30 = smov %s2311_s15  ;;  %s3357_s15 = smov %s2768_s27 }
 0x620   : > { %s3358_s16 = smov %s2756_s23  ;;  %36 = sbr.rel (!%p34_p4) target bundleno = 18 (0x12), region = 173 }
 0x627   :  { %1374 = vsyncpa [#allocation3], 1 }
 0x628   :  { %1376 = vsyncpa [#allocation3 + $0x1], 1 }
 0x629   :  { %1377 = vsyncpa [#allocation6], 1 }
 0x62a   :  { %1378 = vsyncpa [#allocation9], 1 }
 0x62b   :  { %1379 = vsyncpa [#allocation12], 1 }
 0x62c   :  { %1380 = vsyncpa [#allocation15], 1 }
 0x62d   :  { %1381 = vsyncpa [#allocation18], 1 }
 0x62e   :  { %1382 = vsyncpa [#allocation21], 1 }
 0x62f   :  { %1383 = vsyncpa [#allocation24], 1 }
 0x630   :  { %1384 = vsyncpa [#allocation4], 1 }
 0x631   :  { %1386 = vsyncpa [#allocation4 + $0x1], 1 }

</bundles_post_ra>
